<compile_context>
chip_gen: v6e
topology: v6e:2x2x1
jax: 0.10.0
libtpu: 0.0.40
codegen_flags: <defaults>
</compile_context>

<pallas_src>
import math

import jax
import jax.numpy as jnp
from jax.experimental import pallas as pl
from jax.experimental.pallas import tpu as pltpu

# ---- HashGrid config, mirrors tcnn.Encoding(3, {...}) in SDF.__init__ ----
N_DIMS = 3
N_LEVELS = 12
N_FEATS = 2
LOG2_HASHMAP_SIZE = 15
BASE_RESOLUTION = 16
PER_LEVEL_SCALE = 1.5
ENC_DIM = N_LEVELS * N_FEATS        # 24  (encoder.n_output_dims)
HIDDEN = 64
CF_ROWS = 8 * N_FEATS * N_LEVELS    # 192 = corners * feats * levels (multiple of 16)

_PRIMES = (1, 2654435761, 805459861)  # tcnn spatial-hash primes
_CHUNK = 256                          # in-kernel column-chunk width (lanes)


def _level_meta():
    """Per-level (scale, resolution, hashmap_size) exactly as tinycudann computes them."""
    metas = []
    max_params = 1 << LOG2_HASHMAP_SIZE
    for l in range(N_LEVELS):
        scale = float(BASE_RESOLUTION) * (PER_LEVEL_SCALE ** l) - 1.0
        resolution = int(math.ceil(scale)) + 1
        params = resolution ** N_DIMS
        params_in_level = max_params if params > max_params else params
        params_in_level = ((params_in_level + 7) // 8) * 8  # next multiple of 8
        metas.append((scale, resolution, params_in_level))
    return metas


LEVEL_META = _level_meta()


# ---------------------------------------------------------------------------
# JAX glue: hash indexing + table gather (data-dependent random access).
# ---------------------------------------------------------------------------
def _grid_index(pos_grid, resolution, hashmap_size):
    """pos_grid: [N, 3] uint32 -> int32 indices into the level's table."""
    stride = 1
    lin = jnp.zeros(pos_grid.shape[:1], dtype=jnp.uint32)
    for d in range(N_DIMS):
        if stride <= hashmap_size:
            lin = lin + pos_grid[:, d] * jnp.uint32(stride)
            stride *= resolution
    if hashmap_size < stride:  # hash this level (coarse levels are dense-indexed)
        idx = jnp.zeros(pos_grid.shape[:1], dtype=jnp.uint32)
        for d in range(N_DIMS):
            idx = idx ^ (pos_grid[:, d] * jnp.uint32(_PRIMES[d]))
    else:
        idx = lin
    return (idx % jnp.uint32(hashmap_size)).astype(jnp.int32)


def hashgrid_corner_features(x, tables_t):
    """x: [N, 3] float32 in [0,1];  tables_t[l]: [N_FEATS, size_l] bf16 (pre-transposed).

    Returns cf: [192, N] bf16, row = corner*24 + feature*12 + level, points on lanes.
    The gather output is already in the kernel layout, so no transposes materialize.
    """
    n = x.shape[0]
    grids = []
    for (scale, _, _) in LEVEL_META:
        grids.append(jnp.floor(x * scale + 0.5).astype(jnp.uint32))   # [N, 3]

    corner_slabs = []
    for c in range(8):
        bits = jnp.asarray([(c >> d) & 1 for d in range(N_DIMS)], dtype=jnp.uint32)
        feats = []
        for l, (_, resolution, hashmap_size) in enumerate(LEVEL_META):
            idx = _grid_index(grids[l] + bits, resolution, hashmap_size)
            # TODO(synk): this gather stays in XLA; an in-kernel TPU gather over the
            #             32k-entry tables has no efficient Pallas lowering.
            feats.append(jnp.take(tables_t[l], idx, axis=1))          # [2, N] bf16
        # [2, 12, N] -> [24, N]  (row = feature*12 + level)
        corner_slabs.append(jnp.stack(feats, axis=1).reshape(N_FEATS * N_LEVELS, n))
    return jnp.concatenate(corner_slabs, axis=0)                      # [192, N] bf16


# ---------------------------------------------------------------------------
# Pallas kernel: frac rebuild + trilinear blend + Linear(24,64) -> ReLU -> Linear(64,1)
# ---------------------------------------------------------------------------
def _sdf_kernel(cf_ref, x_ref, scales_ref, w1a_ref, w1b_ref, b1_ref, w2_ref, b2_ref,
                out_ref):
    # cf_ref    : [192, TN] bf16  corner features (corner-major, then feature, then level)
    # x_ref     : [3, TN]   f32   raw query points
    # scales_ref: [12, 1]   f32   per-level grid scales
    # w1a/w1b   : [64, 12]  f32   Linear(24,64) weights split by feature parity
    # b1_ref    : [64, 1]   w2_ref: [64, 1]   b2_ref: [1, 1] (SMEM)   out_ref: [1, TN]
    t = out_ref.shape[1]
    c_w = min(_CHUNK, t)
    num_chunks = t // c_w

    # Column-chunked inner loop: bounds live ranges so the unrolled 8-corner blend
    # never spills vregs, while the DMA tile (TN) stays large.
    @pl.loop(0, num_chunks)
    def _(ci):
        off = pl.multiple_of(ci * c_w, c_w)
        cols = pl.ds(off, c_w)

        scales = scales_ref[...]                       # [12, 1]
        x = x_ref[:, cols]                             # [3, C]
        # Per-level fractional coords, rebuilt in-kernel with the identical f32
        # expression used on the XLA side for the corner-index floor.
        px = x[0:1, :] * scales + 0.5                  # [12, C]
        py = x[1:2, :] * scales + 0.5
        pz = x[2:3, :] * scales + 0.5
        fx = px - jnp.floor(px)
        fy = py - jnp.floor(py)
        fz = pz - jnp.floor(pz)
        gz = 1.0 - fz
        # Factored bilinear xy products: 4 muls instead of 8 per level.
        w00 = (1.0 - fx) * (1.0 - fy)
        w10 = fx * (1.0 - fy)
        w01 = (1.0 - fx) * fy
        w11 = fx * fy
        wxy = (w00, w10, w01, w11)

        enc0 = jnp.zeros((N_LEVELS, c_w), jnp.float32)   # feature 0 of each level
        enc1 = jnp.zeros((N_LEVELS, c_w), jnp.float32)   # feature 1 of each level
        for c in range(8):                               # static unroll over 8 corners
            w = wxy[c & 3] * (fz if (c & 4) else gz)     # [12, C] corner weight (VPU)
            base = c * N_FEATS * N_LEVELS
            f0 = cf_ref[pl.ds(base, N_LEVELS), cols].astype(jnp.float32)
            f1 = cf_ref[pl.ds(base + N_LEVELS, N_LEVELS), cols].astype(jnp.float32)
            enc0 = enc0 + w * f0
            enc1 = enc1 + w * f1

        # Linear(24, 64): two K=12 MXU matmuls (points on lanes) + bias, ReLU.
        h = (jnp.dot(w1a_ref[...], enc0, preferred_element_type=jnp.float32)
             + jnp.dot(w1b_ref[...], enc1, preferred_element_type=jnp.float32)
             + b1_ref[...])
        h = jnp.maximum(h, 0.0)                          # [64, C]

        # Linear(64, 1): VPU multiply + sublane (XLU) reduction (no 1-wide matmul).
        out_ref[:, cols] = (jnp.sum(h * w2_ref[...], axis=0, keepdims=True)
                            + b2_ref[0, 0])


def _pick_tile(n, tile_n):
    # Big DMA tiles amortize the ~0.35us per-grid-step overhead; the in-kernel chunk
    # loop keeps register pressure flat regardless of t.
    t = min(tile_n, max(_CHUNK, pl.cdiv(n, _CHUNK) * _CHUNK))
    # Prefer >= 4 grid steps so both v7x TensorCores get pipelined (double-buffered) work.
    while t > _CHUNK and pl.cdiv(n, t) < 4:
        t //= 2
    return max(_CHUNK, (t // _CHUNK) * _CHUNK)


def sdf_forward(x, tables_t, w1, b1, w2, b2, *, tile_n=2048):
    n = x.shape[0]
    t = _pick_tile(n, tile_n)
    n_pad = pl.cdiv(n, t) * t

    # Pad x (12 B/point) *before* the gather so cf/frac never get re-materialized.
    x_padded = jnp.pad(x, ((0, n_pad - n), (0, 0))) if n_pad != n else x

    cf = hashgrid_corner_features(x_padded, tables_t)    # [192, n_pad] bf16
    xt = jnp.transpose(x_padded)                         # [3, n_pad]   f32
    scales = jnp.asarray([m[0] for m in LEVEL_META], jnp.float32).reshape(N_LEVELS, 1)

    # Decoder weights, rearranged for the points-on-lanes kernel layout.
    w1a = jnp.transpose(w1[0::2, :])                     # [64, 12] (feature-0 channels)
    w1b = jnp.transpose(w1[1::2, :])                     # [64, 12] (feature-1 channels)
    b1c = b1.reshape(HIDDEN, 1)
    w2c = w2.reshape(HIDDEN, 1)
    b2c = b2.reshape(1, 1)

    out = pl.pallas_call(
        _sdf_kernel,
        out_shape=jax.ShapeDtypeStruct((1, n_pad), jnp.float32),
        grid=(n_pad // t,),
        in_specs=[
            pl.BlockSpec((CF_ROWS, t), lambda i: (0, i)),
            pl.BlockSpec((N_DIMS, t), lambda i: (0, i)),
            pl.BlockSpec((N_LEVELS, 1), lambda i: (0, 0)),
            pl.BlockSpec((HIDDEN, N_LEVELS), lambda i: (0, 0)),
            pl.BlockSpec((HIDDEN, N_LEVELS), lambda i: (0, 0)),
            pl.BlockSpec((HIDDEN, 1), lambda i: (0, 0)),
            pl.BlockSpec((HIDDEN, 1), lambda i: (0, 0)),
            pl.BlockSpec(memory_space=pltpu.MemorySpace.SMEM),
        ],
        out_specs=pl.BlockSpec((1, t), lambda i: (0, i)),
        compiler_params=pltpu.CompilerParams(
            dimension_semantics=("parallel",),
        ),
    )(cf, xt, scales, w1a, w1b, b1c, w2c, b2c)

    return out.reshape(n_pad, 1)[:n]


# ---------------------------------------------------------------------------
# Deterministic parameter init (synthetic; mirrors shapes from SDF.__init__)
# ---------------------------------------------------------------------------
def init_params(key):
    keys = jax.random.split(key, N_LEVELS + 4)
    # hash tables: tcnn initializes uniform in [-1e-4, 1e-4], stored half precision.
    # Stored pre-transposed as [N_FEATS, size] so the gather emits the kernel layout.
    tables_t = [
        jax.random.uniform(keys[l], (N_FEATS, size), jnp.float32, -1e-4, 1e-4
                           ).astype(jnp.bfloat16)
        for l, (_, _, size) in enumerate(LEVEL_META)
    ]
    k1, k2, k3, k4 = keys[N_LEVELS:]
    bound1 = 1.0 / math.sqrt(ENC_DIM)
    w1 = jax.random.uniform(k1, (ENC_DIM, HIDDEN), jnp.float32, -bound1, bound1)
    b1 = jax.random.uniform(k2, (1, HIDDEN), jnp.float32, -bound1, bound1)
    bound2 = 1.0 / math.sqrt(HIDDEN)
    w2 = jax.random.uniform(k3, (HIDDEN, 1), jnp.float32, -bound2, bound2)
    b2 = jax.random.uniform(k4, (1, 1), jnp.float32, -bound2, bound2)
    return tables_t, w1, b1, w2, b2


if __name__ == "__main__":
    key = jax.random.PRNGKey(0)
    pkey, xkey = jax.random.split(key)
    tables_t, w1, b1, w2, b2 = init_params(pkey)

    n = 2048
    x = jax.random.uniform(xkey, (n, 3), jnp.float32)   # query points in [0, 1)^3

    sdf = jax.block_until_ready(jax.jit(sdf_forward)(x, tables_t, w1, b1, w2, b2))

    # Pure-JAX reference for sanity (same bf16 table values, f32 math).
    cf4 = hashgrid_corner_features(x, tables_t).astype(jnp.float32).reshape(
        8, N_FEATS, N_LEVELS, n)
    scales_arr = jnp.asarray([m[0] for m in LEVEL_META], jnp.float32)
    pos = x[:, None, :] * scales_arr[None, :, None] + 0.5          # [n, 12, 3]
    frac = pos - jnp.floor(pos)
    fx, fy, fz = (jnp.transpose(frac[..., d]) for d in range(3))   # each [12, n]
    enc0 = jnp.zeros_like(fx)
    enc1 = jnp.zeros_like(fx)
    for c in range(8):
        wx = fx if (c & 1) else 1.0 - fx
        wy = fy if ((c >> 1) & 1) else 1.0 - fy
        wz = fz if ((c >> 2) & 1) else 1.0 - fz
        w = wx * wy * wz
        enc0 = enc0 + w * cf4[c, 0]
        enc1 = enc1 + w * cf4[c, 1]
    enc = jnp.zeros((n, ENC_DIM), jnp.float32)
    enc = enc.at[:, 0::2].set(enc0.T).at[:, 1::2].set(enc1.T)      # tcnn channel order
    h = jnp.maximum(jnp.dot(enc, w1, precision=jax.lax.Precision.HIGHEST) + b1, 0.0)
    ref = jnp.dot(h, w2, precision=jax.lax.Precision.HIGHEST) + b2

    assert sdf.shape == (n, 1)
    assert jnp.allclose(sdf, ref, atol=1e-3, rtol=1e-3), float(jnp.max(jnp.abs(sdf - ref)))
    print("KERNEL_OK")
</pallas_src>

<mosaic_0001>
module attributes {stable_mosaic.version = 11 : i64} {
  func.func @_sdf_kernel(%arg0: i32, %arg1: memref<192x512xbf16, #tpu.memory_space<vmem>>, %arg2: memref<3x512xf32, #tpu.memory_space<vmem>>, %arg3: memref<12x1xf32, #tpu.memory_space<vmem>>, %arg4: memref<64x12xf32, #tpu.memory_space<vmem>>, %arg5: memref<64x12xf32, #tpu.memory_space<vmem>>, %arg6: memref<64x1xf32, #tpu.memory_space<vmem>>, %arg7: memref<64x1xf32, #tpu.memory_space<vmem>>, %arg8: memref<1x1xf32, #tpu.memory_space<smem>>, %arg9: memref<1x512xf32, #tpu.memory_space<vmem>>) attributes {dimension_semantics = [#tpu.dimension_semantics<parallel>], iteration_bounds = array<i64: 4>, scalar_prefetch = 0 : i64, scratch_operands = 0 : i64, tpu.core_type = #tpu.core_type<tc>, window_params = [{transform_indices = @transform_0, window_bounds = array<i64: 192, 512>}, {transform_indices = @transform_1, window_bounds = array<i64: 3, 512>}, {pipeline_mode = #tpu.pipeline_mode<synchronous>, transform_indices = @transform_2, window_bounds = array<i64: 12, 1>}, {pipeline_mode = #tpu.pipeline_mode<synchronous>, transform_indices = @transform_3, window_bounds = array<i64: 64, 12>}, {pipeline_mode = #tpu.pipeline_mode<synchronous>, transform_indices = @transform_4, window_bounds = array<i64: 64, 12>}, {pipeline_mode = #tpu.pipeline_mode<synchronous>, transform_indices = @transform_5, window_bounds = array<i64: 64, 1>}, {pipeline_mode = #tpu.pipeline_mode<synchronous>, transform_indices = @transform_6, window_bounds = array<i64: 64, 1>}, {transform_indices = @transform_7, window_bounds = array<i64: 1, 1>}, {transform_indices = @transform_8, window_bounds = array<i64: 1, 512>}]} {
    %c0_i32 = arith.constant 0 : i32
    %c2_i32 = arith.constant 2 : i32
    %0 = arith.addi %c0_i32, %c2_i32 : i32
    %c1_i32 = arith.constant 1 : i32
    scf.for %arg10 = %c0_i32 to %0 step %c1_i32  : i32 {
      %c1_i32_1 = arith.constant 1 : i32
      %1 = arith.muli %arg10, %c1_i32_1 : i32
      %c0_i32_2 = arith.constant 0 : i32
      %2 = arith.addi %c0_i32_2, %1 : i32
      %c256_i32 = arith.constant 256 : i32
      %3 = arith.muli %2, %c256_i32 : i32
      %4 = tpu.assume_multiple %3, 256 : i32
      %c0 = arith.constant 0 : index
      %c0_3 = arith.constant 0 : index
      %5 = vector.load %arg3[%c0, %c0_3] : memref<12x1xf32, #tpu.memory_space<vmem>>, vector<12x1xf32>
      %c0_4 = arith.constant 0 : index
      %6 = arith.index_cast %4 : i32 to index
      %7 = vector.load %arg2[%c0_4, %6] : memref<3x512xf32, #tpu.memory_space<vmem>>, vector<3x256xf32>
      %8 = vector.extract_strided_slice %7 {offsets = [0, 0], sizes = [1, 256], strides = [1, 1]} : vector<3x256xf32> to vector<1x256xf32>
      %9 = vector.broadcast %8 : vector<1x256xf32> to vector<12x256xf32>
      %10 = vector.broadcast %5 : vector<12x1xf32> to vector<12x256xf32>
      %11 = arith.mulf %9, %10 : vector<12x256xf32>
      %cst = arith.constant 5.000000e-01 : f32
      %12 = vector.broadcast %cst : f32 to vector<12x256xf32>
      %13 = arith.addf %11, %12 : vector<12x256xf32>
      %14 = vector.extract_strided_slice %7 {offsets = [1, 0], sizes = [1, 256], strides = [1, 1]} : vector<3x256xf32> to vector<1x256xf32>
      %15 = vector.broadcast %14 : vector<1x256xf32> to vector<12x256xf32>
      %16 = vector.broadcast %5 : vector<12x1xf32> to vector<12x256xf32>
      %17 = arith.mulf %15, %16 : vector<12x256xf32>
      %cst_5 = arith.constant 5.000000e-01 : f32
      %18 = vector.broadcast %cst_5 : f32 to vector<12x256xf32>
      %19 = arith.addf %17, %18 : vector<12x256xf32>
      %20 = vector.extract_strided_slice %7 {offsets = [2, 0], sizes = [1, 256], strides = [1, 1]} : vector<3x256xf32> to vector<1x256xf32>
      %21 = vector.broadcast %20 : vector<1x256xf32> to vector<12x256xf32>
      %22 = vector.broadcast %5 : vector<12x1xf32> to vector<12x256xf32>
      %23 = arith.mulf %21, %22 : vector<12x256xf32>
      %cst_6 = arith.constant 5.000000e-01 : f32
      %24 = vector.broadcast %cst_6 : f32 to vector<12x256xf32>
      %25 = arith.addf %23, %24 : vector<12x256xf32>
      %26 = math.floor %13 : vector<12x256xf32>
      %27 = arith.subf %13, %26 : vector<12x256xf32>
      %28 = math.floor %19 : vector<12x256xf32>
      %29 = arith.subf %19, %28 : vector<12x256xf32>
      %30 = math.floor %25 : vector<12x256xf32>
      %31 = arith.subf %25, %30 : vector<12x256xf32>
      %cst_7 = arith.constant 1.000000e+00 : f32
      %32 = vector.broadcast %cst_7 : f32 to vector<12x256xf32>
      %33 = arith.subf %32, %31 : vector<12x256xf32>
      %cst_8 = arith.constant 1.000000e+00 : f32
      %34 = vector.broadcast %cst_8 : f32 to vector<12x256xf32>
      %35 = arith.subf %34, %27 : vector<12x256xf32>
      %cst_9 = arith.constant 1.000000e+00 : f32
      %36 = vector.broadcast %cst_9 : f32 to vector<12x256xf32>
      %37 = arith.subf %36, %29 : vector<12x256xf32>
      %38 = arith.mulf %35, %37 : vector<12x256xf32>
      %cst_10 = arith.constant 1.000000e+00 : f32
      %39 = vector.broadcast %cst_10 : f32 to vector<12x256xf32>
      %40 = arith.subf %39, %29 : vector<12x256xf32>
      %41 = arith.mulf %27, %40 : vector<12x256xf32>
      %cst_11 = arith.constant 1.000000e+00 : f32
      %42 = vector.broadcast %cst_11 : f32 to vector<12x256xf32>
      %43 = arith.subf %42, %27 : vector<12x256xf32>
      %44 = arith.mulf %43, %29 : vector<12x256xf32>
      %45 = arith.mulf %27, %29 : vector<12x256xf32>
      %cst_12 = arith.constant 0.000000e+00 : f32
      %46 = vector.broadcast %cst_12 : f32 to vector<12x256xf32>
      %cst_13 = arith.constant 0.000000e+00 : f32
      %47 = vector.broadcast %cst_13 : f32 to vector<12x256xf32>
      %48 = arith.mulf %38, %33 : vector<12x256xf32>
      %c0_14 = arith.constant 0 : index
      %49 = arith.index_cast %4 : i32 to index
      %50 = vector.load %arg1[%c0_14, %49] : memref<192x512xbf16, #tpu.memory_space<vmem>>, vector<12x256xbf16>
      %51 = arith.extf %50 : vector<12x256xbf16> to vector<12x256xf32>
      %c12 = arith.constant 12 : index
      %52 = arith.index_cast %4 : i32 to index
      %53 = vector.load %arg1[%c12, %52] : memref<192x512xbf16, #tpu.memory_space<vmem>>, vector<12x256xbf16>
      %54 = arith.extf %53 : vector<12x256xbf16> to vector<12x256xf32>
      %55 = arith.mulf %48, %51 : vector<12x256xf32>
      %56 = arith.addf %46, %55 : vector<12x256xf32>
      %57 = arith.mulf %48, %54 : vector<12x256xf32>
      %58 = arith.addf %47, %57 : vector<12x256xf32>
      %59 = arith.mulf %41, %33 : vector<12x256xf32>
      %c24 = arith.constant 24 : index
      %60 = arith.index_cast %4 : i32 to index
      %61 = vector.load %arg1[%c24, %60] : memref<192x512xbf16, #tpu.memory_space<vmem>>, vector<12x256xbf16>
      %62 = arith.extf %61 : vector<12x256xbf16> to vector<12x256xf32>
      %c36 = arith.constant 36 : index
      %63 = arith.index_cast %4 : i32 to index
      %64 = vector.load %arg1[%c36, %63] : memref<192x512xbf16, #tpu.memory_space<vmem>>, vector<12x256xbf16>
      %65 = arith.extf %64 : vector<12x256xbf16> to vector<12x256xf32>
      %66 = arith.mulf %59, %62 : vector<12x256xf32>
      %67 = arith.addf %56, %66 : vector<12x256xf32>
      %68 = arith.mulf %59, %65 : vector<12x256xf32>
      %69 = arith.addf %58, %68 : vector<12x256xf32>
      %70 = arith.mulf %44, %33 : vector<12x256xf32>
      %c48 = arith.constant 48 : index
      %71 = arith.index_cast %4 : i32 to index
      %72 = vector.load %arg1[%c48, %71] : memref<192x512xbf16, #tpu.memory_space<vmem>>, vector<12x256xbf16>
      %73 = arith.extf %72 : vector<12x256xbf16> to vector<12x256xf32>
      %c60 = arith.constant 60 : index
      %74 = arith.index_cast %4 : i32 to index
      %75 = vector.load %arg1[%c60, %74] : memref<192x512xbf16, #tpu.memory_space<vmem>>, vector<12x256xbf16>
      %76 = arith.extf %75 : vector<12x256xbf16> to vector<12x256xf32>
      %77 = arith.mulf %70, %73 : vector<12x256xf32>
      %78 = arith.addf %67, %77 : vector<12x256xf32>
      %79 = arith.mulf %70, %76 : vector<12x256xf32>
      %80 = arith.addf %69, %79 : vector<12x256xf32>
      %81 = arith.mulf %45, %33 : vector<12x256xf32>
      %c72 = arith.constant 72 : index
      %82 = arith.index_cast %4 : i32 to index
      %83 = vector.load %arg1[%c72, %82] : memref<192x512xbf16, #tpu.memory_space<vmem>>, vector<12x256xbf16>
      %84 = arith.extf %83 : vector<12x256xbf16> to vector<12x256xf32>
      %c84 = arith.constant 84 : index
      %85 = arith.index_cast %4 : i32 to index
      %86 = vector.load %arg1[%c84, %85] : memref<192x512xbf16, #tpu.memory_space<vmem>>, vector<12x256xbf16>
      %87 = arith.extf %86 : vector<12x256xbf16> to vector<12x256xf32>
      %88 = arith.mulf %81, %84 : vector<12x256xf32>
      %89 = arith.addf %78, %88 : vector<12x256xf32>
      %90 = arith.mulf %81, %87 : vector<12x256xf32>
      %91 = arith.addf %80, %90 : vector<12x256xf32>
      %92 = arith.mulf %38, %31 : vector<12x256xf32>
      %c96 = arith.constant 96 : index
      %93 = arith.index_cast %4 : i32 to index
      %94 = vector.load %arg1[%c96, %93] : memref<192x512xbf16, #tpu.memory_space<vmem>>, vector<12x256xbf16>
      %95 = arith.extf %94 : vector<12x256xbf16> to vector<12x256xf32>
      %c108 = arith.constant 108 : index
      %96 = arith.index_cast %4 : i32 to index
      %97 = vector.load %arg1[%c108, %96] : memref<192x512xbf16, #tpu.memory_space<vmem>>, vector<12x256xbf16>
      %98 = arith.extf %97 : vector<12x256xbf16> to vector<12x256xf32>
      %99 = arith.mulf %92, %95 : vector<12x256xf32>
      %100 = arith.addf %89, %99 : vector<12x256xf32>
      %101 = arith.mulf %92, %98 : vector<12x256xf32>
      %102 = arith.addf %91, %101 : vector<12x256xf32>
      %103 = arith.mulf %41, %31 : vector<12x256xf32>
      %c120 = arith.constant 120 : index
      %104 = arith.index_cast %4 : i32 to index
      %105 = vector.load %arg1[%c120, %104] : memref<192x512xbf16, #tpu.memory_space<vmem>>, vector<12x256xbf16>
      %106 = arith.extf %105 : vector<12x256xbf16> to vector<12x256xf32>
      %c132 = arith.constant 132 : index
      %107 = arith.index_cast %4 : i32 to index
      %108 = vector.load %arg1[%c132, %107] : memref<192x512xbf16, #tpu.memory_space<vmem>>, vector<12x256xbf16>
      %109 = arith.extf %108 : vector<12x256xbf16> to vector<12x256xf32>
      %110 = arith.mulf %103, %106 : vector<12x256xf32>
      %111 = arith.addf %100, %110 : vector<12x256xf32>
      %112 = arith.mulf %103, %109 : vector<12x256xf32>
      %113 = arith.addf %102, %112 : vector<12x256xf32>
      %114 = arith.mulf %44, %31 : vector<12x256xf32>
      %c144 = arith.constant 144 : index
      %115 = arith.index_cast %4 : i32 to index
      %116 = vector.load %arg1[%c144, %115] : memref<192x512xbf16, #tpu.memory_space<vmem>>, vector<12x256xbf16>
      %117 = arith.extf %116 : vector<12x256xbf16> to vector<12x256xf32>
      %c156 = arith.constant 156 : index
      %118 = arith.index_cast %4 : i32 to index
      %119 = vector.load %arg1[%c156, %118] : memref<192x512xbf16, #tpu.memory_space<vmem>>, vector<12x256xbf16>
      %120 = arith.extf %119 : vector<12x256xbf16> to vector<12x256xf32>
      %121 = arith.mulf %114, %117 : vector<12x256xf32>
      %122 = arith.addf %111, %121 : vector<12x256xf32>
      %123 = arith.mulf %114, %120 : vector<12x256xf32>
      %124 = arith.addf %113, %123 : vector<12x256xf32>
      %125 = arith.mulf %45, %31 : vector<12x256xf32>
      %c168 = arith.constant 168 : index
      %126 = arith.index_cast %4 : i32 to index
      %127 = vector.load %arg1[%c168, %126] : memref<192x512xbf16, #tpu.memory_space<vmem>>, vector<12x256xbf16>
      %128 = arith.extf %127 : vector<12x256xbf16> to vector<12x256xf32>
      %c180 = arith.constant 180 : index
      %129 = arith.index_cast %4 : i32 to index
      %130 = vector.load %arg1[%c180, %129] : memref<192x512xbf16, #tpu.memory_space<vmem>>, vector<12x256xbf16>
      %131 = arith.extf %130 : vector<12x256xbf16> to vector<12x256xf32>
      %132 = arith.mulf %125, %128 : vector<12x256xf32>
      %133 = arith.addf %122, %132 : vector<12x256xf32>
      %134 = arith.mulf %125, %131 : vector<12x256xf32>
      %135 = arith.addf %124, %134 : vector<12x256xf32>
      %c0_15 = arith.constant 0 : index
      %c0_16 = arith.constant 0 : index
      %136 = vector.load %arg4[%c0_15, %c0_16] : memref<64x12xf32, #tpu.memory_space<vmem>>, vector<64x12xf32>
      %cst_17 = arith.constant dense<0.000000e+00> : vector<64x256xf32>
      %137 = tpu.matmul %136, %133, %cst_17 {dimension_numbers = #tpu.dot_dimension_numbers<[1], [0], [0], [1], [0, 0, 1, 1], [], []>} : vector<64x12xf32>, vector<12x256xf32>, vector<64x256xf32> -> vector<64x256xf32>
      %c0_18 = arith.constant 0 : index
      %c0_19 = arith.constant 0 : index
      %138 = vector.load %arg5[%c0_18, %c0_19] : memref<64x12xf32, #tpu.memory_space<vmem>>, vector<64x12xf32>
      %cst_20 = arith.constant dense<0.000000e+00> : vector<64x256xf32>
      %139 = tpu.matmul %138, %135, %cst_20 {dimension_numbers = #tpu.dot_dimension_numbers<[1], [0], [0], [1], [0, 0, 1, 1], [], []>} : vector<64x12xf32>, vector<12x256xf32>, vector<64x256xf32> -> vector<64x256xf32>
      %140 = arith.addf %137, %139 : vector<64x256xf32>
      %c0_21 = arith.constant 0 : index
      %c0_22 = arith.constant 0 : index
      %141 = vector.load %arg6[%c0_21, %c0_22] : memref<64x1xf32, #tpu.memory_space<vmem>>, vector<64x1xf32>
      %142 = vector.broadcast %141 : vector<64x1xf32> to vector<64x256xf32>
      %143 = arith.addf %140, %142 : vector<64x256xf32>
      %cst_23 = arith.constant 0.000000e+00 : f32
      %144 = vector.broadcast %cst_23 : f32 to vector<64x256xf32>
      %145 = arith.maximumf %143, %144 : vector<64x256xf32>
      %c0_24 = arith.constant 0 : index
      %c0_25 = arith.constant 0 : index
      %146 = vector.load %arg7[%c0_24, %c0_25] : memref<64x1xf32, #tpu.memory_space<vmem>>, vector<64x1xf32>
      %147 = vector.broadcast %146 : vector<64x1xf32> to vector<64x256xf32>
      %148 = arith.mulf %145, %147 : vector<64x256xf32>
      %cst_26 = arith.constant dense<0.000000e+00> : vector<256xf32>
      %149 = vector.multi_reduction <add>, %148, %cst_26 [0] : vector<64x256xf32> to vector<256xf32>
      %150 = vector.shape_cast %149 : vector<256xf32> to vector<1x256xf32>
      %c0_27 = arith.constant 0 : index
      %c0_28 = arith.constant 0 : index
      %151 = memref.load %arg8[%c0_27, %c0_28] : memref<1x1xf32, #tpu.memory_space<smem>>
      %152 = vector.broadcast %151 : f32 to vector<1x256xf32>
      %153 = arith.addf %150, %152 : vector<1x256xf32>
      %c0_29 = arith.constant 0 : index
      %154 = arith.index_cast %4 : i32 to index
      %155 = vector.load %arg9[%c0_29, %154] : memref<1x512xf32, #tpu.memory_space<vmem>>, vector<1x256xf32>
      tpu.vector_store %arg9[%c0_29, %154], %153 {strides = array<i32>} : memref<1x512xf32, #tpu.memory_space<vmem>>, vector<1x256xf32>,
    }
    %c2_i32_0 = arith.constant 2 : i32
    return
  }
  func.func @transform_0(%arg0: i32) -> (i32, i32) {
    %c0_i32 = arith.constant 0 : i32
    %c0_i32_0 = arith.constant 0 : i32
    return %c0_i32, %arg0 : i32, i32
  }
  func.func @transform_1(%arg0: i32) -> (i32, i32) {
    %c0_i32 = arith.constant 0 : i32
    %c0_i32_0 = arith.constant 0 : i32
    return %c0_i32, %arg0 : i32, i32
  }
  func.func @transform_2(%arg0: i32) -> (i32, i32) {
    %c0_i32 = arith.constant 0 : i32
    %c0_i32_0 = arith.constant 0 : i32
    %c0_i32_1 = arith.constant 0 : i32
    return %c0_i32, %c0_i32_0 : i32, i32
  }
  func.func @transform_3(%arg0: i32) -> (i32, i32) {
    %c0_i32 = arith.constant 0 : i32
    %c0_i32_0 = arith.constant 0 : i32
    %c0_i32_1 = arith.constant 0 : i32
    return %c0_i32, %c0_i32_0 : i32, i32
  }
  func.func @transform_4(%arg0: i32) -> (i32, i32) {
    %c0_i32 = arith.constant 0 : i32
    %c0_i32_0 = arith.constant 0 : i32
    %c0_i32_1 = arith.constant 0 : i32
    return %c0_i32, %c0_i32_0 : i32, i32
  }
  func.func @transform_5(%arg0: i32) -> (i32, i32) {
    %c0_i32 = arith.constant 0 : i32
    %c0_i32_0 = arith.constant 0 : i32
    %c0_i32_1 = arith.constant 0 : i32
    return %c0_i32, %c0_i32_0 : i32, i32
  }
  func.func @transform_6(%arg0: i32) -> (i32, i32) {
    %c0_i32 = arith.constant 0 : i32
    %c0_i32_0 = arith.constant 0 : i32
    %c0_i32_1 = arith.constant 0 : i32
    return %c0_i32, %c0_i32_0 : i32, i32
  }
  func.func @transform_7(%arg0: i32) -> (i32, i32) {
    %c0_i32 = arith.constant 0 : i32
    %c0_i32_0 = arith.constant 0 : i32
    %c0_i32_1 = arith.constant 0 : i32
    return %c0_i32, %c0_i32_0 : i32, i32
  }
  func.func @transform_8(%arg0: i32) -> (i32, i32) {
    %c0_i32 = arith.constant 0 : i32
    %c0_i32_0 = arith.constant 0 : i32
    return %c0_i32, %arg0 : i32, i32
  }
}

</mosaic_0001>

<bundles_post_ra>
// kernel: sdf_forward.1
= control target key start
LH: loop header
LB: loop body
LE: loop exit
PB: predicated region body
PF: predicated region fallthrough
CT: control target
= control target key end

     0   :  { %s2580_s0 = inlined_call_operand.vmem [shape: bf16[192,2048], index: 0, kind: input, shape index: {}]   ;;  %s2581_s1 = inlined_call_operand.vmem [shape: f32[3,2048], index: 1, kind: input, shape index: {}]   ;;  %s2582_s2 = inlined_call_operand.vmem [shape: f32[12,1], index: 2, kind: input, shape index: {}]   ;;  %s2583_s3 = inlined_call_operand.vmem [shape: f32[64,12], index: 3, kind: input, shape index: {}]   ;;  %s2584_s4 = inlined_call_operand.vmem [shape: f32[64,12], index: 4, kind: input, shape index: {}]   ;;  %s2585_s5 = inlined_call_operand.vmem [shape: f32[64,1], index: 5, kind: input, shape index: {}]   ;;  %s2586_s6 = inlined_call_operand.vmem [shape: f32[64,1], index: 6, kind: input, shape index: {}]   ;;  %s2587_s7 = inlined_call_operand.<no memory space> [shape: f32[1,1], index: 7, kind: input, shape index: {}]   ;;  %s2588_s8 = inlined_call_operand.hbm [shape: f32[1,2048], index: 8, kind: output, shape index: {}]  }
   0x1   :  { %13 = sst [smem:[#allocation2]] %s2587_s7 }
   0x2   :  { %14 = vsyncpa [#allocation5], 0 }
   0x3   :  { %16 = vsyncpa [#allocation5 + $0x1], 0  ;;  %s1787_s29 = smov 0   ;;  %s1789_s30 = smov 0  }
   0x4   :  { %s1791_s9 = smov 0   ;;  %s1793_s10 = smov 0  }
   0x5 LB: > { %s1808_s7 = sadd.s32 4294967295, %s1729_s10   ;;  %s1572_s11 = sadd.s32 4294967294, %s1729_s10   ;;  %s1729_s10 = sphi %s1793_s10, %s2689_s10   ;;  %s1725_s9 = sphi %s1791_s9, %s2688_s9   ;;  %s1721_s30 = sphi %s1789_s30, %s2687_s30   ;;  %s1717_s29 = sphi %s1787_s29, %s2686_s29  }
   0x6   : > { %s1812_s12 = sadd.s32 1, %s1729_s10   ;;  %s29_s13 = sadd.s32 1, %s1725_s9 }
   0x7   : > { %s26_s14 = ssub.s32 %s1729_s10, %s1812_s12  ;;  %p36_p0 = scmp.ne.s32.totalorder %s1725_s9, %s1721_s30 }
   0x8   : > { %p27_p1 = scmp.eq.s32.totalorder %s26_s14, 0  ;;  %p37_p2 = scmp.eq.s32.totalorder %s1729_s10, 0 }
   0x9   : > { %p218_p3 = scmp.eq.s32.totalorder %s1808_s7, 3  ;;  %p223_p4 = scmp.ne.s32.totalorder %s1721_s30, %s1717_s29 }
   0xa   : > { %s1824_s15 = scalar_select %p27_p1, %s1725_s9, %s29_s13  }
   0xb   : > { %p38_p5 = por %p37_p2, %p36_p0  ;;  %p1826_p6 = por %p218_p3, %p36_p0 }
   0xc   : > { %p224_p7 = scmp.eq.s32.totalorder %s1572_s11, 3  ;;  %p1574_p9 = scmp.ge.s32.totalorder %s1729_s10, 4 }
   0xe   : > { %p1830_p8 = por %p224_p7, %p223_p4  ;;  %258 = sbr.rel (%p1574_p9) target bundleno = 47 (0x2f), region = 40 }
  0x13   : > { %261 = sbr.rel (!%p38_p5) target bundleno = 47 (0x2f), region = 44  ;;  %s263_s18 = sand.u32 (%p38_p5), 1, %s1725_s9  }
  0x14   : > { %s1609_s19 = sshll.u32 (%p38_p5), %s1729_s10, 4  ;;  %s1611_s20 = smul.u32 (%p38_p5), 384, %s263_s18 }
  0x15   : > { %s1840_s23 = scalar_lea.vmem (%p38_p5), %s2580_s0, %s1609_s19 }
  0x16   : > { %v281_v0 = vld [vmem:[%s1840_s23] sm:$0xff] (%p38_p5)  ;;  %v283_v1 = vld [vmem:[%s1840_s23 + $0x8] sm:$0xff] (%p38_p5)  ;;  %s1848_s24 = scalar_lea.vmem (%p38_p5), [#allocation3], %s1611_s20 }
  0x17   : > { %v285_v2 = vld [vmem:[%s1840_s23 + $0x40] sm:$0xff] (%p38_p5)  ;;  %v287_v3 = vld [vmem:[%s1840_s23 + $0x48] sm:$0xff] (%p38_p5)  ;;  %282 = vst [vmem:[%s1848_s24] sm:$0xff] (%p38_p5), %v281_v0  ;;  %284 = vst [vmem:[%s1848_s24 + $0x8] sm:$0xff] (%p38_p5), %v283_v1 }
  0x18   : > { %v289_v4 = vld [vmem:[%s1840_s23 + $0x80] sm:$0xff]  ;;  %v291_v5 = vld [vmem:[%s1840_s23 + $0x88] sm:$0xff]  ;;  %286 = vst [vmem:[%s1848_s24 + $0x10] sm:$0xff] %v285_v2  ;;  %288 = vst [vmem:[%s1848_s24 + $0x18] sm:$0xff] %v287_v3 }
  0x19   : > { %290 = vst [vmem:[%s1848_s24 + $0x20] sm:$0xff] %v289_v4  ;;  %292 = vst [vmem:[%s1848_s24 + $0x28] sm:$0xff] %v291_v5  ;;  %v293_v6 = vld [vmem:[%s1840_s23 + $0xc0] sm:$0xff]  ;;  %v295_v7 = vld [vmem:[%s1840_s23 + $0xc8] sm:$0xff] }
  0x1a   : > { %v297_v8 = vld [vmem:[%s1840_s23 + $0x100] sm:$0xff]  ;;  %294 = vst [vmem:[%s1848_s24 + $0x30] sm:$0xff] %v293_v6  ;;  %296 = vst [vmem:[%s1848_s24 + $0x38] sm:$0xff] %v295_v7  ;;  %v299_v9 = vld [vmem:[%s1840_s23 + $0x108] sm:$0xff] }
  0x1b   : > { %298 = vst [vmem:[%s1848_s24 + $0x40] sm:$0xff] %v297_v8  ;;  %v301_v10 = vld [vmem:[%s1840_s23 + $0x140] sm:$0xff]  ;;  %v303_v11 = vld [vmem:[%s1840_s23 + $0x148] sm:$0xff]  ;;  %300 = vst [vmem:[%s1848_s24 + $0x48] sm:$0xff] %v299_v9 }
  0x1c   : > { %302 = vst [vmem:[%s1848_s24 + $0x50] sm:$0xff] %v301_v10  ;;  %304 = vst [vmem:[%s1848_s24 + $0x58] sm:$0xff] %v303_v11  ;;  %v305_v12 = vld [vmem:[%s1840_s23 + $0x180] sm:$0xff]  ;;  %v307_v13 = vld [vmem:[%s1840_s23 + $0x188] sm:$0xff] }
  0x1d   : > { %v309_v14 = vld [vmem:[%s1840_s23 + $0x1c0] sm:$0xff]  ;;  %306 = vst [vmem:[%s1848_s24 + $0x60] sm:$0xff] %v305_v12  ;;  %308 = vst [vmem:[%s1848_s24 + $0x68] sm:$0xff] %v307_v13  ;;  %v311_v15 = vld [vmem:[%s1840_s23 + $0x1c8] sm:$0xff] }
  0x1e   : > { %310 = vst [vmem:[%s1848_s24 + $0x70] sm:$0xff] %v309_v14  ;;  %v313_v16 = vld [vmem:[%s1840_s23 + $0x200] sm:$0xff]  ;;  %v315_v17 = vld [vmem:[%s1840_s23 + $0x208] sm:$0xff]  ;;  %312 = vst [vmem:[%s1848_s24 + $0x78] sm:$0xff] %v311_v15 }
  0x1f   : > { %314 = vst [vmem:[%s1848_s24 + $0x80] sm:$0xff] %v313_v16  ;;  %316 = vst [vmem:[%s1848_s24 + $0x88] sm:$0xff] %v315_v17  ;;  %v317_v18 = vld [vmem:[%s1840_s23 + $0x240] sm:$0xff]  ;;  %v319_v19 = vld [vmem:[%s1840_s23 + $0x248] sm:$0xff] }
  0x20   : > { %v321_v20 = vld [vmem:[%s1840_s23 + $0x280] sm:$0xff]  ;;  %318 = vst [vmem:[%s1848_s24 + $0x90] sm:$0xff] %v317_v18  ;;  %320 = vst [vmem:[%s1848_s24 + $0x98] sm:$0xff] %v319_v19  ;;  %v323_v21 = vld [vmem:[%s1840_s23 + $0x288] sm:$0xff] }
  0x21   : > { %322 = vst [vmem:[%s1848_s24 + $0xa0] sm:$0xff] %v321_v20  ;;  %v325_v22 = vld [vmem:[%s1840_s23 + $0x2c0] sm:$0xff]  ;;  %v327_v23 = vld [vmem:[%s1840_s23 + $0x2c8] sm:$0xff]  ;;  %324 = vst [vmem:[%s1848_s24 + $0xa8] sm:$0xff] %v323_v21 }
  0x22   : > { %326 = vst [vmem:[%s1848_s24 + $0xb0] sm:$0xff] %v325_v22  ;;  %328 = vst [vmem:[%s1848_s24 + $0xb8] sm:$0xff] %v327_v23  ;;  %v329_v24 = vld [vmem:[%s1840_s23 + $0x300] sm:$0xff]  ;;  %v331_v25 = vld [vmem:[%s1840_s23 + $0x308] sm:$0xff] }
  0x23   : > { %v333_v26 = vld [vmem:[%s1840_s23 + $0x340] sm:$0xff]  ;;  %330 = vst [vmem:[%s1848_s24 + $0xc0] sm:$0xff] %v329_v24  ;;  %332 = vst [vmem:[%s1848_s24 + $0xc8] sm:$0xff] %v331_v25  ;;  %v335_v27 = vld [vmem:[%s1840_s23 + $0x348] sm:$0xff] }
  0x24   : > { %334 = vst [vmem:[%s1848_s24 + $0xd0] sm:$0xff] %v333_v26  ;;  %v337_v28 = vld [vmem:[%s1840_s23 + $0x380] sm:$0xff]  ;;  %v339_v29 = vld [vmem:[%s1840_s23 + $0x388] sm:$0xff]  ;;  %336 = vst [vmem:[%s1848_s24 + $0xd8] sm:$0xff] %v335_v27 }
  0x25   : > { %338 = vst [vmem:[%s1848_s24 + $0xe0] sm:$0xff] %v337_v28  ;;  %340 = vst [vmem:[%s1848_s24 + $0xe8] sm:$0xff] %v339_v29  ;;  %v341_v30 = vld [vmem:[%s1840_s23 + $0x3c0] sm:$0xff]  ;;  %v343_v31 = vld [vmem:[%s1840_s23 + $0x3c8] sm:$0xff] }
  0x26   : > { %v345_v32 = vld [vmem:[%s1840_s23 + $0x400] sm:$0xff]  ;;  %342 = vst [vmem:[%s1848_s24 + $0xf0] sm:$0xff] %v341_v30  ;;  %344 = vst [vmem:[%s1848_s24 + $0xf8] sm:$0xff] %v343_v31  ;;  %v347_v33 = vld [vmem:[%s1840_s23 + $0x408] sm:$0xff] }
  0x27   : > { %346 = vst [vmem:[%s1848_s24 + $0x100] sm:$0xff] %v345_v32  ;;  %v349_v34 = vld [vmem:[%s1840_s23 + $0x440] sm:$0xff]  ;;  %v351_v35 = vld [vmem:[%s1840_s23 + $0x448] sm:$0xff]  ;;  %348 = vst [vmem:[%s1848_s24 + $0x108] sm:$0xff] %v347_v33 }
  0x28   : > { %350 = vst [vmem:[%s1848_s24 + $0x110] sm:$0xff] %v349_v34  ;;  %352 = vst [vmem:[%s1848_s24 + $0x118] sm:$0xff] %v351_v35  ;;  %v353_v36 = vld [vmem:[%s1840_s23 + $0x480] sm:$0xff]  ;;  %v355_v37 = vld [vmem:[%s1840_s23 + $0x488] sm:$0xff] }
  0x29   : > { %v357_v38 = vld [vmem:[%s1840_s23 + $0x4c0] sm:$0xff]  ;;  %354 = vst [vmem:[%s1848_s24 + $0x120] sm:$0xff] %v353_v36  ;;  %356 = vst [vmem:[%s1848_s24 + $0x128] sm:$0xff] %v355_v37  ;;  %v359_v39 = vld [vmem:[%s1840_s23 + $0x4c8] sm:$0xff] }
  0x2a   : > { %358 = vst [vmem:[%s1848_s24 + $0x130] sm:$0xff] %v357_v38  ;;  %v361_v40 = vld [vmem:[%s1840_s23 + $0x500] sm:$0xff]  ;;  %v363_v41 = vld [vmem:[%s1840_s23 + $0x508] sm:$0xff]  ;;  %360 = vst [vmem:[%s1848_s24 + $0x138] sm:$0xff] %v359_v39 }
  0x2b   : > { %362 = vst [vmem:[%s1848_s24 + $0x140] sm:$0xff] %v361_v40  ;;  %364 = vst [vmem:[%s1848_s24 + $0x148] sm:$0xff] %v363_v41  ;;  %v365_v42 = vld [vmem:[%s1840_s23 + $0x540] sm:$0xff]  ;;  %v367_v43 = vld [vmem:[%s1840_s23 + $0x548] sm:$0xff] }
  0x2c   : > { %v369_v44 = vld [vmem:[%s1840_s23 + $0x580] sm:$0xff]  ;;  %366 = vst [vmem:[%s1848_s24 + $0x150] sm:$0xff] %v365_v42  ;;  %368 = vst [vmem:[%s1848_s24 + $0x158] sm:$0xff] %v367_v43  ;;  %v371_v45 = vld [vmem:[%s1840_s23 + $0x588] sm:$0xff] }
  0x2d   : > { %370 = vst [vmem:[%s1848_s24 + $0x160] sm:$0xff] %v369_v44  ;;  %v373_v46 = vld [vmem:[%s1840_s23 + $0x5c0] sm:$0xff]  ;;  %v375_v47 = vld [vmem:[%s1840_s23 + $0x5c8] sm:$0xff]  ;;  %372 = vst [vmem:[%s1848_s24 + $0x168] sm:$0xff] %v371_v45 }
  0x2e   : > { %374 = vst [vmem:[%s1848_s24 + $0x170] sm:$0xff] %v373_v46  ;;  %376 = vst [vmem:[%s1848_s24 + $0x178] sm:$0xff] %v375_v47 }
  0x2f PF: > { %p1577_p10 = scmp.ge.s32.totalorder %s1729_s10, 1  ;;  %p390_p11 = scmp.lt.s32.totalorder %s1729_s10, 5 }
  0x31   : > { %p391_p12 = pnand %p1577_p10, %p390_p11 }
  0x32   : > { %s1943_s25 = sand.u32 (!%p391_p12), 1, %s1721_s30   ;;  %s1579_s26 = sshll.u32 (!%p391_p12), %s1808_s7, 2 }
  0x33   : > { %394 = sbr.rel (%p391_p12) target bundleno = 526 (0x20e), region = 71  ;;  %s1578_s28 = sshll.u32 (!%p391_p12), %s1943_s25, 2 }
  0x34   : > { %s1612_s27 = smul.u32 (!%p391_p12), 384, %s1943_s25  ;;  %p437_p13 = scmp.lt.s32.totalorder (!%p391_p12), %s1579_s26, 15 }
  0x35   : > { %s1955_s20 = scalar_lea.vmem (!%p391_p12), [#allocation4], %s1578_s28  ;;  %s1957_s21 = smov (!%p391_p12), 0  }
  0x36   : > { %s1953_s19 = scalar_lea.vmem (!%p391_p12), [#allocation3], %s1612_s27 }
  0x38   : > { %s2691_s26 = smov (!%p437_p13, %s1579_s26), 15 }
  0x39   : > { %s1580_s11 = sshll.u32 %s2691_s26, 2 }
  0x3a   : > { %s1951_s18 = scalar_lea.vmem %s2581_s1, %s1580_s11 }
  0x3b LB: >> { %v451_v48 = vld [vmem:[%s2582_s2 + $0x8] sm:$0xf]  ;;  %v1735_v49 = vmov 0   ;;  %v450_v50 = vld [vmem:[%s2582_s2] sm:$0xff]  ;;  %v1274_v51 = vld [vmem:[%s2585_s5 + $0x10] sm:$0xff]  ;;  %v2590_v58 = vmov 0.0   ;;  %v2589_v59 = vlaneseq  ;;  %s1733_s21 = sphi %s1957_s21, %s448_s21  }
  0x3c   : >> { %1663 = vset.pattern.permute.xlu0 %v1735_v49  ;;  %1664 = vset.pattern.permute.xlu1 %v1735_v49  ;;  %v1352_v52 = vld [vmem:[%s2586_s6] sm:$0xff]  ;;  %v1277_v54 = vld [vmem:[%s2585_s5 + $0x28] sm:$0xff]  ;;  %v1278_v55 = vld [vmem:[%s2585_s5 + $0x30] sm:$0xff]  ;;  %s1581_s22 = sshll.u32 %s1733_s21, 8  ;;  %vm628_vm0 = vcmask 1043456   ;;  %vm985_vm1 = vcmask 97280  }
  0x3d   : >> { %483 = vperm.xlu0 %1663, %v451_v48   ;;  %v1276_v53 = vld [vmem:[%s2585_s5 + $0x20] sm:$0xff]  ;;  %v1279_v56 = vld [vmem:[%s2585_s5 + $0x38] sm:$0xff]  ;;  %v1358_v57 = vld [vmem:[%s2586_s6 + $0x30] sm:$0xff]  ;;  %1080 = vmatprep.mubr.f32.mxu0 %v2590_v58  ;;  %s1992_s23 = sshra.s32 %s1581_s22, 7  ;;  %v1996_v60 = vshrl.u32 %v2589_v59, 7  ;;  %s1442_s14 = sld [smem:[#allocation2]] }
  0x3e   : >> { %1223 = vmatprep.mubr.f32.mxu1 %v2590_v58  ;;  %s1582_s24 = sshll.u32 %s1992_s23, 2  ;;  %v1272_v1 = vld [vmem:[%s2585_s5] sm:$0xff]  ;;  %v1273_v5 = vld [vmem:[%s2585_s5 + $0x8] sm:$0xff]  ;;  %v1275_v21 = vld [vmem:[%s2585_s5 + $0x18] sm:$0xff]  ;;  %s1464_s22 = scalar_lea.vmem %s1955_s20, %s1992_s23 [#allocation4] }
  0x3f   : >> { %2611 = vst [vmem:[#allocation7_spill] sm:$0xff] %v1996_v60  ;;  %s455_s26 = scalar_lea.vmem %s1951_s18, %s1582_s24  ;;  %v460_v61 = vsub.s32 0, %v1996_v60  ;;  %v464_v62 = vsub.s32 4, %v1996_v60  ;;  %v496_v63 = vsub.s32 1, %v1996_v60  ;;  %s2003_s27 = scalar_lea.vmem %s1953_s19, %s1582_s24 [#allocation3]  ;;  %v500_v2 = vsub.s32 5, %v1996_v60  ;;  %1282 = vperm.xlu1 %1664, %v1272_v1   ;;  %v1353_v40 = vld [vmem:[%s2586_s6 + $0x8] sm:$0xff] }
  0x40   : >> { %v456_v0 = vld [vmem:[%s455_s26] sm:$0x77]  ;;  %v522_v3 = vsub.s32 2, %v1996_v60  ;;  %v526_v4 = vsub.s32 6, %v1996_v60  ;;  %v2018_v9 = vld [vmem:[%s2003_s27 + $0xb0] sm:$0xff]  ;;  %s448_s21 = sadd.s32 1, %s1733_s21  }
  0x41   : >> { %478 = vperm.xlu0 %1663, %v450_v50   ;;  %v461_v6 = vrot.slane %v456_v0, %v460_v61  ;;  %v465_v7 = vrot.slane %v456_v0, %v464_v62  ;;  %v2015_v8 = vld [vmem:[%s2003_s27 + $0x20] sm:$0xff]  ;;  %v497_v10 = vrot.slane %v456_v0, %v496_v63  ;;  %v2021_v11 = vld [vmem:[%s2003_s27 + $0x50] sm:$0xff]  ;;  %v501_v13 = vrot.slane %v456_v0, %v500_v2  ;;  %p445_p0 = scmp.ge.s32.totalorder %s448_s21, 2  }
  0x42   : >> { %v2024_v12 = vld [vmem:[%s2003_s27 + $0x80] sm:$0xff]  ;;  %v523_v14 = vrot.slane %v456_v0, %v522_v3  ;;  %v527_v15 = vrot.slane %v456_v0, %v526_v4  ;;  %v2030_v17 = vld [vmem:[%s2003_s27 + $0x110] sm:$0xff]  ;;  %v615_v19 = vunpack.c.h.bf16 %v2015_v8  ;;  %v754_v20 = vunpack.c.h.bf16 %v2018_v9  ;;  %s1610_s24 = sshll.u32 (%p445_p0), %s1808_s7, 6  ;;  %s1485_s23 = sshll.u32 (%p445_p0), %s1955_s20, 4  ;;  %s1486_s23 = int_to_ptr.vmem [resolvable:$true] %s1485_s23 }
  0x43   : >> { %v2027_v16 = vld [vmem:[%s2003_s27 + $0xe0] sm:$0xff]  ;;  %v2033_v18 = vld [vmem:[%s2003_s27 + $0x170] sm:$0xff]  ;;  %1287 = vperm.xlu1 %1664, %v1273_v5   ;;  %v2040_v22 = vrot.slane %v461_v6, %v460_v61  ;;  %v2042_v23 = vrot.slane %v465_v7, %v460_v61  ;;  %v662_v24 = vunpack.c.h.bf16 %v2021_v11  ;;  %v708_v25 = vunpack.c.h.bf16 %v2024_v12  ;;  %s1483_s11 = scalar_lea.hbm (%p445_p0), %s2588_s8, %s1610_s24  ;;  %s1665_s13 = scalar_lea.vmem (%p445_p0), %s1486_s23, 64 }
  0x44   : >> { %v2047_v26 = vld [vmem:[%s2003_s27 + $0x140] sm:$0xff]  ;;  %v2049_v27 = vrot.slane %v497_v10, %v496_v63  ;;  %v800_v28 = vunpack.c.h.bf16 %v2027_v16  ;;  %v846_v29 = vunpack.c.h.bf16 %v2030_v17  ;;  %v938_v30 = vunpack.c.h.bf16 %v2033_v18  ;;  %v2068_v39 = vld [vmem:[%s2003_s27 + $0x10] sm:$0x33]  ;;  %v2116_v2 = vld [vmem:[%s2003_s27 + $0x70] sm:$0xcc]  ;;  %p1666_p1 = scmp.ne.s32.totalorder (%p445_p0), %s1486_s23, %s1665_s13 }
  0x45   : >> { %1292 = vperm.xlu0 %1663, %v1274_v51   ;;  %v2054_v31 = vrot.slane %v501_v13, %v496_v63  ;;  %v2056_v32 = vrot.slane %v523_v14, %v522_v3  ;;  %v2058_v33 = vrot.slane %v527_v15, %v522_v3  ;;  %v753_v34 = vunpack.c.l.bf16 %v2018_v9  ;;  %v2080_v45 = vld [vmem:[%s2003_s27 + $0x40] sm:$0x33]  ;;  %v2083_v46 = vld [vmem:[%s2003_s27 + $0x70] sm:$0x33]  ;;  %v2095_v51 = vld [vmem:[%s2003_s27 + $0xa0] sm:$0xcc] }
  0x46   : >> { %v2061_v35 = vrot.slane %v615_v19, 4  ;;  %v2063_v36 = vrot.slane %v754_v20, 4  ;;  %v892_v37 = vunpack.c.h.bf16 %v2047_v26  ;;  %v937_v38 = vunpack.c.l.bf16 %v2033_v18  ;;  %v2086_v47 = vld [vmem:[%s2003_s27 + $0xa0] sm:$0x33]  ;;  %v2108_v61 = vld [vmem:[%s2003_s27 + $0x40] sm:$0xcc]  ;;  %p1667_p2 = pnand (%p445_p0), %p1666_p1, %p1826_p6 }
  0x47   : >> { %1297 = vperm.xlu1 %1664, %v1275_v21   ;;  %v614_v41 = vunpack.c.l.bf16 %v2015_v8  ;;  %v661_v42 = vunpack.c.l.bf16 %v2021_v11  ;;  %v2075_v43 = vrot.slane %v662_v24, 4  ;;  %v2077_v44 = vrot.slane %v708_v25, 4  ;;  %v2119_v3 = vld [vmem:[%s2003_s27 + $0xd0] sm:$0xcc]  ;;  %v2128_v8 = vld [vmem:[%s2003_s27 + $0x100] sm:$0x33] }
  0x48   : >> { %v2088_v48 = vrot.slane %v800_v28, 4  ;;  %v2090_v49 = vrot.slane %v846_v29, 4  ;;  %v2092_v50 = vrot.slane %v938_v30, 4  ;;  %v2110_v62 = vrot.slane %v892_v37, 4  ;;  %v1354_v4 = vld [vmem:[%s2586_s6 + $0x10] sm:$0xff]  ;;  %p1668_p3 = pneg (%p445_p0), %p1667_p2 }
  0x49   : >> { %1362 = vperm.xlu0 %1663, %v1352_v52   ;;  %v707_v52 = vunpack.c.l.bf16 %v2024_v12  ;;  %v2131_v10 = vld [vmem:[%s2003_s27 + $0x130] sm:$0x33]  ;;  %v752_v11 = vunpack.c.h.bf16 %v2095_v51  ;;  %v2135_v12 = vld [vmem:[%s2003_s27 + $0x100] sm:$0xcc]  ;;  %v2140_v15 = vld [vmem:[%s2003_s27 + $0x160] sm:$0x33]  ;;  %v706_v21 = vunpack.c.h.bf16 %v2116_v2  ;;  %v798_v24 = vunpack.c.h.bf16 %v2119_v3 }
  0x4a   : >> { %v2149_v25 = vld [vmem:[%s2003_s27 + $0x130] sm:$0xcc]  ;;  %v844_v37 = vunpack.c.h.bf16 %v2135_v12  ;;  %v2166_v1 = vrot.slane %v614_v41, 4  ;;  %v2168_v63 = vrot.slane %v661_v42, 4  ;;  %v1356_v41 = vld [vmem:[%s2586_s6 + $0x20] sm:$0xff]  ;;  %v2190_v9 = vrot.slane %v937_v38, 4 }
  0x4b   : >> { %1367 = vperm.xlu1 %1664, %v1353_v40   ;;  %v1355_v40 = vld [vmem:[%s2586_s6 + $0x18] sm:$0xff]  ;;  %v890_v6 = vunpack.c.h.bf16 %v2149_v25  ;;  %v724_v29 = vrot.slane %v706_v21, 4  ;;  %v816_v20 = vrot.slane %v798_v24, 4  ;;  %v2170_v58 = vrot.slane %v707_v52, 4  ;;  %v2179_v19 = vld [vmem:[%s2003_s27 + $0x90] sm:$0xff]  ;;  %v2211_v24 = vld [vmem:[%s2003_s27 + $0x60] sm:$0xff] }
  0x4c   : >> { %2612 = vst [vmem:[#allocation8_spill] sm:$0xff] %v2179_v19  ;;  %v2208_v38 = vld [vmem:[%s2003_s27 + $0x30] sm:$0xff]  ;;  %2616 = vst [vmem:[#allocation12_spill] sm:$0xff] %v2211_v24  ;;  %v659_v59 = vunpack.c.l.bf16 %v2108_v61  ;;  %v705_v0 = vunpack.c.l.bf16 %v2116_v2  ;;  %v1359_v2 = vld [vmem:[%s2586_s6 + $0x38] sm:$0xff] }
  0x4d   : >> { %1302 = vperm.xlu0 %1663, %v1276_v53   ;;  %v799_v53 = vunpack.c.l.bf16 %v2027_v16  ;;  %2615 = vst [vmem:[#allocation11_spill] sm:$0xff] %v2208_v38  ;;  %v2235_v14 = vld [vmem:[%s2003_s27 + $0xf0] sm:$0xff]  ;;  %v2634_v38 = vunpack.c.h.bf16 %v2080_v45 }
  0x4e   : >> { %2621 = vst [vmem:[#allocation17_spill] sm:$0xff] %v2235_v14 }
  0x4f   : >> { %1372 = vperm.xlu1 %1664, %v1354_v4   ;;  %v770_v4 = vrot.slane %v752_v11, 4  ;;  %v2174_v11 = vrot.slane %v753_v34, 4 }
  0x51   : >> { %1307 = vperm.xlu0 %1663, %v1277_v54   ;;  %v845_v54 = vunpack.c.l.bf16 %v2030_v17  ;;  %v660_v17 = vunpack.c.h.bf16 %v2108_v61  ;;  %v2194_v34 = vsel %vm628_vm0, %v770_v4, %v2063_v36  ;;  %v1357_v4 = vld [vmem:[%s2586_s6 + $0x28] sm:$0xff] }
  0x52   : >> { %2613 = vst [vmem:[#allocation9_spill] sm:$0xff] %v2194_v34 }
  0x53   : >> { %v678_v28 = vrot.slane %v660_v17, 4  ;;  %1377 = vperm.xlu1 %1664, %v1355_v40   ;;  %v862_v17 = vrot.slane %v844_v37, 4  ;;  %v2184_v42 = vrot.slane %v845_v54, 4  ;;  %v2214_v37 = vld [vmem:[%s2003_s27 + $0x150] sm:$0xff]  ;;  %v2218_v40 = vsel %vm628_vm0, %v724_v29, %v2077_v44  ;;  %v2238_v29 = vld [vmem:[%s2003_s27 + $0x120] sm:$0xff] }
  0x54   : >> { %2617 = vst [vmem:[#allocation13_spill] sm:$0xff] %v2214_v37  ;;  %2622 = vst [vmem:[#allocation18_spill] sm:$0xff] %v2238_v29 }
  0x55   : >> { %1312 = vperm.xlu0 %1663, %v1278_v55   ;;  %v891_v55 = vunpack.c.l.bf16 %v2047_v26  ;;  %v2152_v26 = vld [vmem:[%s2003_s27 + $0x160] sm:$0xcc]  ;;  %v2205_v54 = vsel %vm628_vm0, %v678_v28, %v2075_v43 }
  0x56   : >> { %v936_v30 = vunpack.c.h.bf16 %v2152_v26  ;;  %v2226_v28 = vld [vmem:[%s2003_s27 + $0xc0] sm:$0xff]  ;;  %v935_v7 = vunpack.c.l.bf16 %v2152_v26 }
  0x57   : >> { %v2186_v52 = vrot.slane %v891_v55, 4  ;;  %v908_v55 = vrot.slane %v890_v6, 4  ;;  %2619 = vst [vmem:[#allocation15_spill] sm:$0xff] %v2226_v28  ;;  %v751_v6 = vunpack.c.l.bf16 %v2095_v51  ;;  %1382 = vperm.xlu1 %1664, %v1356_v41  }
  0x58   : >> { %v954_v18 = vrot.slane %v936_v30, 4  ;;  %v2231_v30 = vsel %vm628_vm0, %v862_v17, %v2090_v49  ;;  %v797_v17 = vunpack.c.l.bf16 %v2119_v3  ;;  %v675_v3 = vrot.slane %v659_v59, 4 }
  0x59   : >> { %1317 = vperm.xlu0 %1663, %v1279_v56   ;;  %v2102_v56 = vld [vmem:[%s2003_s27 + $0xd0] sm:$0x33]  ;;  %2620 = vst [vmem:[#allocation16_spill] sm:$0xff] %v2231_v30  ;;  %v2251_v5 = vsel %vm628_vm0, %v908_v55, %v2110_v62  ;;  %v767_v60 = vrot.slane %v751_v6, 4  ;;  %v843_v55 = vunpack.c.l.bf16 %v2135_v12 }
  0x5a   : >> { %2623 = vst [vmem:[#allocation19_spill] sm:$0xff] %v2251_v5  ;;  %v889_v5 = vunpack.c.l.bf16 %v2149_v25  ;;  %v721_v25 = vrot.slane %v705_v0, 4  ;;  %v813_v29 = vrot.slane %v797_v17, 4 }
  0x5b   : >> { %1387 = vperm.xlu1 %1664, %v1357_v4   ;;  %v2279_v30 = vrot.slane %v843_v55, 4 }
  0x5c   : >> { %v2281_v59 = vrot.slane %v889_v5, 4  ;;  %v2293_v5 = vsel %vm628_vm0, %v675_v3, %v2168_v63 }
  0x5d   : >> { %1392 = vperm.xlu0 %1663, %v1358_v57   ;;  %v2105_v57 = vld [vmem:[%s2003_s27 + $0x10] sm:$0xcc]  ;;  %2627 = vst [vmem:[#allocation23_spill] sm:$0xff] %v2279_v30  ;;  %2630 = vst [vmem:[#allocation26_spill] sm:$0xff] %v2293_v5 }
  0x5e   : >> { %v613_v16 = vunpack.c.h.bf16 %v2105_v57  ;;  %2628 = vst [vmem:[#allocation24_spill] sm:$0xff] %v2281_v59 }
  0x5f   : >> { %1397 = vperm.xlu1 %1664, %v1359_v2  }
  0x60   : >> { %v632_v13 = vrot.slane %v613_v16, 4  ;;  %v2176_v16 = vrot.slane %v799_v53, 4  ;;  %v2197_v53 = vld [vmem:[%s2003_s27] sm:$0xff]  ;;  %s1471_s27 = scalar_lea.sflag (%p445_p0), [#allocation5], %s1943_s25 }
  0x61   : >> { %2614 = vst [vmem:[#allocation10_spill] sm:$0xff] %v2197_v53 }
  0x62   : >> { %v2201_v21 = vsel %vm628_vm0, %v632_v13, %v2061_v35  ;;  %v2222_v13 = vsel %vm628_vm0, %v816_v20, %v2088_v48  ;;  %v612_v20 = vunpack.c.l.bf16 %v2105_v57  ;;  %v2255_v57 = vsel %vm628_vm0, %v954_v18, %v2092_v50 }
  0x63   : >> { %2618 = vst [vmem:[#allocation14_spill] sm:$0xff] %v2222_v13  ;;  %2624 = vst [vmem:[#allocation20_spill] sm:$0xff] %v2255_v57  ;;  %v2264_v18 = vrot.slane %v935_v7, 4  ;;  %v2306_v3 = vsel %vm628_vm0, %v813_v29, %v2176_v16 }
  0x64   : >> { %v629_v37 = vrot.slane %v612_v20, 4  ;;  %2632 = vst [vmem:[#allocation28_spill] sm:$0xff] %v2306_v3 }
  0x65   : >> { %2625 = vst [vmem:[#allocation21_spill] sm:$0xff] %v2264_v18  ;;  %v2277_v18 = vsel %vm628_vm0, %v767_v60, %v2174_v11 }
  0x66   : >> { %2626 = vst [vmem:[#allocation22_spill] sm:$0xff] %v2277_v18 }
  0xb8   : >> { %v484_v61 = vpop.permute.xlu0 %483 }
  0xb9   : >> { %v488_v51 = vmul.f32 %v484_v61, %v2040_v22  ;;  %v489_v41 = vmul.f32 %v484_v61, %v2042_v23  ;;  %v514_v6 = vmul.f32 %v2049_v27, %v484_v61  ;;  %v515_v4 = vmul.f32 %v2054_v31, %v484_v61 }
  0xba   : >> { %v540_v20 = vmul.f32 %v2056_v32, %v484_v61  ;;  %v541_v12 = vmul.f32 %v2058_v33, %v484_v61 }
  0xbb   : >> { %v492_v7 = vadd.f32 0.5, %v488_v51  ;;  %v518_v26 = vadd.f32 0.5, %v514_v6  ;;  %v493_v13 = vadd.f32 0.5, %v489_v41  ;;  %v2287_v51 = vsel %vm628_vm0, %v629_v37, %v2166_v1 }
  0xbc   : >> { %v544_v57 = vadd.f32 0.5, %v540_v20  ;;  %v545_v14 = vadd.f32 0.5, %v541_v12  ;;  %v479_v28 = vpop.permute.xlu0 %478  ;;  %2629 = vst [vmem:[#allocation25_spill] sm:$0xff] %v2287_v51  ;;  %v519_v60 = vadd.f32 0.5, %v515_v4 }
  0xbd   : >> { %v486_v24 = vmul.f32 %v479_v28, %v2040_v22  ;;  %v487_v0 = vmul.f32 %v479_v28, %v2042_v23  ;;  %v548_v61 = vfloor.f32 %v492_v7  ;;  %v513_v2 = vmul.f32 %v2054_v31, %v479_v28 }
  0xbe   : >> { %v565_v17 = vfloor.f32 %v545_v14  ;;  %v556_v6 = vfloor.f32 %v518_v26  ;;  %v512_v55 = vmul.f32 %v2049_v27, %v479_v28  ;;  %v564_v22 = vfloor.f32 %v544_v57 }
  0xbf   : >> { %v491_v20 = vadd.f32 0.5, %v487_v0  ;;  %v517_v41 = vadd.f32 0.5, %v513_v2  ;;  %v2297_v23 = vsel %vm628_vm0, %v721_v25, %v2170_v58  ;;  %v2300_v12 = vadd.f32 0.5, %v486_v24 }
  0xc0   : >> { %2631 = vst [vmem:[#allocation27_spill] sm:$0xff] %v2297_v23  ;;  %v569_v4 = vsub.f32 %v545_v14, %v565_v17  ;;  %v538_v31 = vmul.f32 %v2056_v32, %v479_v28  ;;  %v539_v0 = vmul.f32 %v2058_v33, %v479_v28  ;;  %v552_v27 = vsub.f32 %v492_v7, %v548_v61 }
  0xc1   : >> { %v549_v59 = vfloor.f32 %v493_v13  ;;  %v557_v30 = vfloor.f32 %v519_v60  ;;  %v560_v2 = vsub.f32 %v518_v26, %v556_v6  ;;  %v2308_v18 = vadd.f32 0.5, %v512_v55 }
  0xc2   : >> { %v547_v25 = vfloor.f32 %v491_v20  ;;  %v555_v23 = vfloor.f32 %v517_v41  ;;  %v2310_v37 = vadd.f32 0.5, %v538_v31  ;;  %v2313_v17 = vsub.f32 %v544_v57, %v564_v22 }
  0xc3   : >> { %v553_v14 = vsub.f32 %v493_v13, %v549_v59  ;;  %v561_v24 = vsub.f32 %v519_v60, %v557_v30  ;;  %v543_v33 = vadd.f32 0.5, %v539_v0  ;;  %v573_v7 = vsub.f32 1.0, %v569_v4 }
  0xc4   : >> { %v576_v26 = vsub.f32 1.0, %v552_v27  ;;  %v2316_v6 = vsub.f32 %v491_v20, %v547_v25  ;;  %v2319_v31 = vsub.f32 %v517_v41, %v555_v23  ;;  %v580_v13 = vsub.f32 1.0, %v560_v2 }
  0xc5   : >> { %v577_v61 = vsub.f32 1.0, %v553_v14  ;;  %v581_v29 = vsub.f32 1.0, %v561_v24  ;;  %v597_v3 = vmul.f32 %v561_v24, %v553_v14  ;;  %v563_v22 = vfloor.f32 %v543_v33 }
  0xc6   : >> { %v572_v28 = vsub.f32 1.0, %v2313_v17  ;;  %v584_v20 = vmul.f32 %v580_v13, %v576_v26  ;;  %v588_v41 = vmul.f32 %v580_v13, %v552_v27  ;;  %v596_v53 = vmul.f32 %v560_v2, %v552_v27 }
  0xc7   : >> { %v585_v59 = vmul.f32 %v581_v29, %v577_v61  ;;  %v589_v57 = vmul.f32 %v581_v29, %v553_v14  ;;  %v593_v60 = vmul.f32 %v577_v61, %v561_v24  ;;  %v742_v0 = vmul.f32 %v597_v3, %v573_v7 }
  0xc8   : >> { %v926_v32 = vmul.f32 %v597_v3, %v569_v4  ;;  %v2633_v14 = vunpack.c.h.bf16 %v2068_v39  ;;  %v592_v61 = vmul.f32 %v576_v26, %v560_v2  ;;  %v2327_v29 = vsub.f32 %v543_v33, %v563_v22 }
  0xc9   : >> { %v601_v5 = vmul.f32 %v585_v59, %v573_v7  ;;  %v650_v51 = vmul.f32 %v589_v57, %v573_v7  ;;  %v696_v19 = vmul.f32 %v593_v60, %v573_v7  ;;  %v788_v25 = vmul.f32 %v585_v59, %v569_v4 }
  0xca   : >> { %v834_v34 = vmul.f32 %v589_v57, %v569_v4  ;;  %v880_v55 = vmul.f32 %v593_v60, %v569_v4  ;;  %v780_v3 = vmul.f32 %v2063_v36, %v742_v0  ;;  %v2635_v33 = vunpack.c.h.bf16 %v2083_v46 }
  0xcb   : >> { %v642_v23 = vmul.f32 %v2061_v35, %v601_v5  ;;  %v688_v30 = vmul.f32 %v2075_v43, %v650_v51  ;;  %v619_v24 = vmul.f32 %v2633_v14, %v601_v5  ;;  %v666_v7 = vmul.f32 %v2634_v38, %v650_v51 }
  0xcc   : >> { %v734_v4 = vmul.f32 %v2077_v44, %v696_v19  ;;  %v826_v13 = vmul.f32 %v2088_v48, %v788_v25  ;;  %v964_v35 = vmul.f32 %v2092_v50, %v926_v32  ;;  %v872_v43 = vmul.f32 %v2090_v49, %v834_v34 }
  0xcd   : >> { %v692_v59 = vadd.f32 %v688_v30, %v642_v23  ;;  %v918_v5 = vmul.f32 %v2110_v62, %v880_v55  ;;  %v670_v26 = vadd.f32 %v666_v7, %v619_v24  ;;  %v712_v57 = vmul.f32 %v2635_v33, %v696_v19 }
  0xce   : >> { %v600_v60 = vmul.f32 %v584_v20, %v572_v28  ;;  %v649_v22 = vmul.f32 %v588_v41, %v572_v28  ;;  %v695_v38 = vmul.f32 %v592_v61, %v572_v28  ;;  %v2636_v27 = vunpack.c.h.bf16 %v2086_v47 }
  0xcf   : >> { %v738_v36 = vadd.f32 %v734_v4, %v692_v59  ;;  %v716_v51 = vadd.f32 %v712_v57, %v670_v26  ;;  %v2637_v48 = vunpack.c.h.bf16 %v2102_v56  ;;  %v741_v50 = vmul.f32 %v596_v53, %v572_v28 }
  0xd0   : >> { %v758_v44 = vmul.f32 %v2636_v27, %v742_v0  ;;  %v641_v49 = vmul.f32 %v2166_v1, %v600_v60  ;;  %v687_v62 = vmul.f32 %v2168_v63, %v649_v22  ;;  %v787_v23 = vmul.f32 %v584_v20, %v2313_v17 }
  0xd1   : >> { %v804_v2 = vmul.f32 %v2637_v48, %v788_v25  ;;  %v784_v30 = vadd.f32 %v780_v3, %v738_v36  ;;  %v2638_v14 = vunpack.c.h.bf16 %v2128_v8  ;;  %v2639_v7 = vunpack.c.h.bf16 %v2131_v10 }
  0xd2   : >> { %v762_v19 = vadd.f32 %v758_v44, %v716_v51  ;;  %v833_v0 = vmul.f32 %v588_v41, %v2313_v17  ;;  %v691_v26 = vadd.f32 %v687_v62, %v641_v49  ;;  %v733_v28 = vmul.f32 %v2170_v58, %v695_v38 }
  0xd3   : >> { %v850_v24 = vmul.f32 %v2638_v14, %v834_v34  ;;  %v896_v59 = vmul.f32 %v2639_v7, %v880_v55  ;;  %v830_v4 = vadd.f32 %v826_v13, %v784_v30  ;;  %v879_v25 = vmul.f32 %v592_v61, %v2313_v17 }
  0xd4   : >> { %v808_v1 = vadd.f32 %v804_v2, %v762_v19  ;;  %v2640_v63 = vunpack.c.h.bf16 %v2140_v15  ;;  %v2641_v20 = vunpack.c.l.bf16 %v2068_v39  ;;  %v2642_v34 = vunpack.c.l.bf16 %v2080_v45 }
  0xd5   : >> { %v876_v36 = vadd.f32 %v872_v43, %v830_v4  ;;  %v737_v55 = vadd.f32 %v733_v28, %v691_v26  ;;  %v779_v41 = vmul.f32 %v2174_v11, %v741_v50  ;;  %v825_v13 = vmul.f32 %v2176_v16, %v787_v23 }
  0xd6   : >> { %v942_v3 = vmul.f32 %v2640_v63, %v926_v32  ;;  %v618_v33 = vmul.f32 %v2641_v20, %v600_v60  ;;  %v665_v57 = vmul.f32 %v2642_v34, %v649_v22  ;;  %v854_v51 = vadd.f32 %v850_v24, %v808_v1 }
  0xd7   : >> { %v871_v58 = vmul.f32 %v2184_v42, %v833_v0  ;;  %v2643_v27 = vunpack.c.l.bf16 %v2083_v46  ;;  %v922_v32 = vadd.f32 %v918_v5, %v876_v36  ;;  %v783_v48 = vadd.f32 %v779_v41, %v737_v55 }
  0xd8   : >> { %v669_v61 = vadd.f32 %v665_v57, %v618_v33  ;;  %v917_v39 = vmul.f32 %v2186_v52, %v879_v25  ;;  %v925_v45 = vmul.f32 %v596_v53, %v2313_v17  ;;  %v900_v60 = vadd.f32 %v896_v59, %v854_v51 }
  0xd9   : >> { %v711_v44 = vmul.f32 %v2643_v27, %v695_v38  ;;  %v2644_v22 = vunpack.c.l.bf16 %v2086_v47  ;;  %v2645_v16 = vunpack.c.l.bf16 %v2102_v56  ;;  %v968_v30 = vadd.f32 %v964_v35, %v922_v32 }
  0xda   : >> { %v829_v49 = vadd.f32 %v825_v13, %v783_v48  ;;  %v575_v62 = vsub.f32 1.0, %v2316_v6  ;;  %v579_v46 = vsub.f32 1.0, %v2319_v31  ;;  %v946_v5 = vadd.f32 %v942_v3, %v900_v60 }
  0xdb   : >> { %v715_v43 = vadd.f32 %v711_v44, %v669_v61  ;;  %v757_v11 = vmul.f32 %v2644_v22, %v741_v50  ;;  %v803_v2 = vmul.f32 %v2645_v16, %v787_v23  ;;  %v571_v19 = vsub.f32 1.0, %v2327_v29  ;;  %1584 = vmatprep.subr.msk.mxu0 %vm628_vm0, %v968_v30  ;;  %v2654_v61 = vld [vmem:[#allocation11_spill] sm:$0xff] }
  0xdc   : >> { %v595_v53 = vmul.f32 %v2319_v31, %v2316_v6  ;;  %v875_v47 = vadd.f32 %v871_v58, %v829_v49  ;;  %v583_v17 = vmul.f32 %v579_v46, %v575_v62  ;;  %v587_v56 = vmul.f32 %v579_v46, %v2316_v6  ;;  %1594 = vmatprep.subr.msk.mxu1 %vm628_vm0, %v946_v5  ;;  %v2660_v5 = vld [vmem:[#allocation8_spill] sm:$0xff] }
  0xdd   : >> { %v761_v38 = vadd.f32 %v757_v11, %v715_v43  ;;  %v591_v35 = vmul.f32 %v575_v62, %v2319_v31  ;;  %v2646_v50 = vfloor.f32 %v2300_v12  ;;  %v963_v14 = vmul.f32 %v2190_v9, %v925_v45  ;;  %v2657_v43 = vld [vmem:[#allocation12_spill] sm:$0xff]  ;;  %v2659_v11 = vld [vmem:[#allocation14_spill] sm:$0xff] }
  0xde   : >> { %v2647_v7 = vunpack.c.l.bf16 %v2128_v8  ;;  %v921_v4 = vadd.f32 %v917_v39, %v875_v47  ;;  %v599_v26 = vmul.f32 %v583_v17, %v571_v19  ;;  %v648_v28 = vmul.f32 %v587_v56, %v571_v19  ;;  %v2656_v39 = vld [vmem:[#allocation9_spill] sm:$0xff] }
  0xdf   : >> { %v550_v23 = vsub.f32 %v2300_v12, %v2646_v50  ;;  %v807_v24 = vadd.f32 %v803_v2, %v761_v38  ;;  %v694_v1 = vmul.f32 %v591_v35, %v571_v19  ;;  %v2648_v6 = vfloor.f32 %v2308_v18 }
  0xe0   : >> { %v849_v59 = vmul.f32 %v2647_v7, %v833_v0  ;;  %v2649_v63 = vfloor.f32 %v2310_v37  ;;  %v2650_v20 = vunpack.c.l.bf16 %v2131_v10  ;;  %v967_v34 = vadd.f32 %v963_v14, %v921_v4  ;;  %v2652_v10 = vld [vmem:[#allocation10_spill] sm:$0xff]  ;;  %v2663_v4 = vld [vmem:[#allocation15_spill] sm:$0xff] }
  0xe1   : >> { %v558_v31 = vsub.f32 %v2308_v18, %v2648_v6  ;;  %v640_v8 = vmul.f32 %v2201_v21, %v599_v26  ;;  %v686_v0 = vmul.f32 %v2205_v54, %v648_v28  ;;  %v740_v57 = vmul.f32 %v595_v53, %v571_v19 }
  0xe2   : >> { %v2391_v12 = vsub.f32 %v2310_v37, %v2649_v63  ;;  %v853_v3 = vadd.f32 %v849_v59, %v807_v24  ;;  %v895_v33 = vmul.f32 %v2650_v20, %v879_v25  ;;  %v2651_v55 = vunpack.c.l.bf16 %v2140_v15  ;;  %1585 = vmatpush1.msk.msra.mxu0 %vm628_vm0, %v967_v34  ;;  %v2666_v34 = vld [vmem:[#allocation17_spill] sm:$0xff] }
  0xe3   : >> { %v786_v18 = vmul.f32 %v583_v17, %v2327_v29  ;;  %v574_v13 = vsub.f32 1.0, %v550_v23  ;;  %v690_v37 = vadd.f32 %v686_v0, %v640_v8  ;;  %v732_v51 = vmul.f32 %v2218_v40, %v694_v1  ;;  %v2662_v17 = vld [vmem:[#allocation16_spill] sm:$0xff] }
  0xe4   : >> { %v899_v36 = vadd.f32 %v895_v33, %v853_v3  ;;  %v941_v41 = vmul.f32 %v2651_v55, %v925_v45  ;;  %v2653_v25 = vunpack.c.h.bf16 %v2652_v10  ;;  %v2655_v21 = vunpack.c.h.bf16 %v2654_v61  ;;  %v2670_v55 = vld [vmem:[#allocation26_spill] sm:$0xff] }
  0xe5   : >> { %v832_v44 = vmul.f32 %v587_v56, %v2327_v29  ;;  %v570_v15 = vsub.f32 1.0, %v2391_v12  ;;  %v653_v32 = vunpack.c.l.bf16 %v2654_v61  ;;  %v736_v48 = vadd.f32 %v732_v51, %v690_v37  ;;  %v2671_v51 = vld [vmem:[#allocation18_spill] sm:$0xff]  ;;  %v2673_v61 = vld [vmem:[#allocation27_spill] sm:$0xff] }
  0xe6   : >> { %v617_v58 = vmul.f32 %v2653_v25, %v599_v26  ;;  %v664_v27 = vmul.f32 %v2655_v21, %v648_v28  ;;  %v945_v54 = vadd.f32 %v941_v41, %v899_v36  ;;  %v778_v45 = vmul.f32 %v2656_v39, %v740_v57 }
  0xe7   : >> { %v2658_v22 = vunpack.c.h.bf16 %v2657_v43  ;;  %v824_v16 = vmul.f32 %v2659_v11, %v786_v18  ;;  %v878_v2 = vmul.f32 %v591_v35, %v2327_v29  ;;  %v578_v30 = vsub.f32 1.0, %v558_v31 }
  0xe8   : >> { %v668_v60 = vadd.f32 %v664_v27, %v617_v58  ;;  %1595 = vmatpush1.msk.msra.mxu1 %vm628_vm0, %v945_v54  ;;  %v590_v49 = vmul.f32 %v574_v13, %v558_v31  ;;  %v782_v62 = vadd.f32 %v778_v45, %v736_v48  ;;  %v2661_v38 = vunpack.c.h.bf16 %v2660_v5 }
  0xe9   : >> { %v710_v40 = vmul.f32 %v2658_v22, %v694_v1  ;;  %v594_v47 = vmul.f32 %v558_v31, %v550_v23  ;;  %v870_v56 = vmul.f32 %v2662_v17, %v832_v44  ;;  %v924_v50 = vmul.f32 %v595_v53, %v2327_v29  ;;  %v2665_v1 = vld [vmem:[#allocation19_spill] sm:$0xff]  ;;  %v2668_v53 = vld [vmem:[#allocation20_spill] sm:$0xff] }
  0xea   : >> { %v756_v19 = vmul.f32 %v2661_v38, %v740_v57  ;;  %v582_v14 = vmul.f32 %v578_v30, %v574_v13  ;;  %v586_v24 = vmul.f32 %v578_v30, %v550_v23  ;;  %v828_v7 = vadd.f32 %v824_v16, %v782_v62  ;;  %v2669_v57 = vld [vmem:[#allocation25_spill] sm:$0xff]  ;;  %v2678_v38 = vld [vmem:[#allocation23_spill] sm:$0xff] }
  0xeb   : >> { %v714_v46 = vadd.f32 %v710_v40, %v668_v60  ;;  %v2664_v26 = vunpack.c.h.bf16 %v2663_v4  ;;  %v693_v35 = vmul.f32 %v590_v49, %v570_v15  ;;  %v916_v6 = vmul.f32 %v2665_v1, %v878_v2  ;;  %v2675_v60 = vld [vmem:[#allocation13_spill] sm:$0xff]  ;;  %v2677_v40 = vld [vmem:[#allocation22_spill] sm:$0xff] }
  0xec   : >> { %v598_v63 = vmul.f32 %v582_v14, %v570_v15  ;;  %v647_v3 = vmul.f32 %v586_v24, %v570_v15  ;;  %v699_v20 = vunpack.c.l.bf16 %v2657_v43  ;;  %v874_v33 = vadd.f32 %v870_v56, %v828_v7  ;;  %v2679_v56 = vld [vmem:[#allocation28_spill] sm:$0xff] }
  0xed   : >> { %v760_v59 = vadd.f32 %v756_v19, %v714_v46  ;;  %v802_v28 = vmul.f32 %v2664_v26, %v786_v18  ;;  %v2667_v8 = vunpack.c.h.bf16 %v2666_v34  ;;  %v739_v29 = vmul.f32 %v594_v47, %v570_v15 }
  0xee   : >> { %v962_v23 = vmul.f32 %v2668_v53, %v924_v50  ;;  %v639_v36 = vmul.f32 %v2669_v57, %v598_v63  ;;  %v685_v41 = vmul.f32 %v2670_v55, %v647_v3  ;;  %v791_v18 = vunpack.c.l.bf16 %v2663_v4  ;;  %v977_v53 = vld [vmem:[%s2584_s4] sm:$0xff]  ;;  %v970_v55 = vld [vmem:[%s2583_s3 + $0x8] sm:$0xff] }
  0xef   : >> { %v806_v31 = vadd.f32 %v802_v28, %v760_v59  ;;  %v848_v0 = vmul.f32 %v2667_v8, %v832_v44  ;;  %v920_v13 = vadd.f32 %v916_v6, %v874_v33  ;;  %v2672_v25 = vunpack.c.h.bf16 %v2671_v51  ;;  %v2682_v6 = vld [vmem:[#allocation21_spill] sm:$0xff] }
  0xf0   : >> { %v731_v21 = vmul.f32 %v2673_v61, %v693_v35  ;;  %v689_v27 = vadd.f32 %v685_v41, %v639_v36  ;;  %v785_v54 = vmul.f32 %v582_v14, %v2391_v12  ;;  %v2674_v44 = vunpack.c.l.bf16 %v2652_v10  ;;  %v978_v36 = vld [vmem:[%s2584_s4 + $0x8] sm:$0xff]  ;;  %v979_v41 = vld [vmem:[%s2584_s4 + $0x10] sm:$0xff] }
  0xf1   : >> { %v852_v37 = vadd.f32 %v848_v0, %v806_v31  ;;  %v894_v58 = vmul.f32 %v2672_v25, %v878_v2  ;;  %v663_v48 = vmul.f32 %v653_v32, %v647_v3  ;;  %v966_v39 = vadd.f32 %v962_v23, %v920_v13  ;;  %v969_v23 = vld [vmem:[%s2583_s3] sm:$0xff]  ;;  %v980_v13 = vld [vmem:[%s2584_s4 + $0x18] sm:$0xff]  ;;  %v974_v61 = vld [vmem:[%s2583_s3 + $0x28] sm:$0xff] }
  0xf2   : >> { %v616_v15 = vmul.f32 %v2674_v44, %v598_v63  ;;  %v2676_v43 = vunpack.c.h.bf16 %v2675_v60  ;;  %v777_v11 = vmul.f32 %v2677_v40, %v739_v29  ;;  %v735_v16 = vadd.f32 %v731_v21, %v689_v27  ;;  %v973_v25 = vld [vmem:[%s2583_s3 + $0x20] sm:$0xff]  ;;  %v983_v21 = vld [vmem:[%s2584_s4 + $0x30] sm:$0xff]  ;;  %v976_v44 = vld [vmem:[%s2583_s3 + $0x38] sm:$0xff] }
  0xf3   : >> { %v898_v45 = vadd.f32 %v894_v58, %v852_v37  ;;  %v831_v30 = vmul.f32 %v586_v24, %v2391_v12  ;;  %v709_v62 = vmul.f32 %v699_v20, %v693_v35  ;;  %1046 = vmatprep.subr.mxu0 %v966_v39  ;;  %v861_v10 = vsel %vm628_vm0, %v2678_v38, %v2184_v42  ;;  %v2681_v24 = vld [vmem:[#allocation24_spill] sm:$0xff]  ;;  %v972_v37 = vld [vmem:[%s2583_s3 + $0x18] sm:$0xff]  ;;  %v982_v58 = vld [vmem:[%s2584_s4 + $0x28] sm:$0xff]  ;;  %v1293_v39 = vpop.permute.xlu0 %1292 }
  0xf4   : >> { %v940_v22 = vmul.f32 %v2676_v43, %v924_v50  ;;  %v667_v2 = vadd.f32 %v663_v48, %v616_v15  ;;  %v877_v32 = vmul.f32 %v590_v49, %v2391_v12  ;;  %v837_v19 = vunpack.c.l.bf16 %v2666_v34  ;;  %v975_v27 = vld [vmem:[%s2583_s3 + $0x30] sm:$0xff]  ;;  %v1283_v15 = vpop.permute.xlu1 %1282 }
  0xf5   : >> { %v781_v17 = vadd.f32 %v777_v11, %v735_v16  ;;  %v823_v50 = vmul.f32 %v2679_v56, %v785_v54  ;;  %v2680_v7 = vunpack.c.l.bf16 %v2660_v5  ;;  %v907_v4 = vsel %vm628_vm0, %v2681_v24, %v2186_v52 }
  0xf6   : >> { %v944_v46 = vadd.f32 %v940_v22, %v898_v45  ;;  %v713_v14 = vadd.f32 %v709_v62, %v667_v2  ;;  %v923_v26 = vmul.f32 %v594_v47, %v2391_v12  ;;  %v883_v42 = vunpack.c.l.bf16 %v2671_v51  ;;  %v981_v51 = vld [vmem:[%s2584_s4 + $0x20] sm:$0xff] }
  0xf7   : >> { %v755_v59 = vmul.f32 %v2680_v7, %v739_v29  ;;  %v827_v28 = vadd.f32 %v823_v50, %v781_v17  ;;  %v869_v49 = vmul.f32 %v861_v10, %v831_v30  ;;  %v801_v1 = vmul.f32 %v791_v18, %v785_v54  ;;  %v971_v18 = vld [vmem:[%s2583_s3 + $0x10] sm:$0xff]  ;;  %v984_v54 = vld [vmem:[%s2584_s4 + $0x38] sm:$0xff]  ;;  %v2534_v43 = vpop.permute.xlu0 %1362 }
  0xf8   : >> { %1189 = vmatprep.subr.mxu1 %v944_v46  ;;  %v953_v63 = vsel %vm628_vm0, %v2682_v6, %v2190_v9  ;;  %v929_v5 = vunpack.c.l.bf16 %v2675_v60  ;;  %v915_v20 = vmul.f32 %v907_v4, %v877_v32  ;;  %v847_v31 = vmul.f32 %v837_v19, %v831_v30  ;;  %v1288_v48 = vpop.permute.xlu1 %1287 }
  0xf9   : >> { %v759_v35 = vadd.f32 %v755_v59, %v713_v14  ;;  %v873_v3 = vadd.f32 %v869_v49, %v827_v28  ;;  %v961_v52 = vmul.f32 %v953_v63, %v923_v26  ;;  %v893_v12 = vmul.f32 %v883_v42, %v877_v32 }
  0xfa   : >> { %v939_v29 = vmul.f32 %v929_v5, %v923_v26  ;;  %v2683_v57 = vmov 0.0  }
  0xfb   : >> { %v805_v33 = vadd.f32 %v801_v1, %v759_v35  ;;  %v919_v34 = vadd.f32 %v915_v20, %v873_v3  ;;  %v1303_v46 = vpop.permute.xlu0 %1302 }
  0xfc   : >> { %v1298_v45 = vpop.permute.xlu1 %1297 }
  0xfd   : >> { %v851_v8 = vadd.f32 %v847_v31, %v805_v33  ;;  %v965_v47 = vadd.f32 %v961_v52, %v919_v34 }
  0xff   : >> { %v897_v0 = vadd.f32 %v893_v12, %v851_v8  ;;  %1047 = vmatpush1.msra.mxu0 %v965_v47  ;;  %v1308_v4 = vpop.permute.xlu0 %1307 }
 0x100   : >> { %1586 = vmatmul.mubr.msk.f32.vlgmr.msra.gmra.mxu0 %vm985_vm1, %v977_v53  ;;  %v1368_v30 = vpop.permute.xlu1 %1367 }
 0x101   : >> { %v943_v9 = vadd.f32 %v939_v29, %v897_v0  ;;  %1086 = vmatprep.mubr.f32.mxu0 %v2683_v57 }
 0x103   : >> { %1190 = vmatpush1.msra.mxu1 %v943_v9  ;;  %v1313_v29 = vpop.permute.xlu0 %1312 }
 0x104   : >> { %1596 = vmatmul.mubr.msk.f32.vlgmr.msra.gmra.mxu1 %vm985_vm1, %v969_v23  ;;  %1587 = vmatmul.mubr.msk.f32.gmra.mxu0 %vm985_vm1, %v978_v36  ;;  %v1373_v56 = vpop.permute.xlu1 %1372 }
 0x105   : >> { %1229 = vmatprep.mubr.f32.mxu1 %v2683_v57  ;;  %1092 = vmatprep.mubr.f32.mxu0 %v2683_v57 }
 0x108   : >> { %1597 = vmatmul.mubr.msk.f32.gmra.mxu1 %vm985_vm1, %v970_v55  ;;  %1588 = vmatmul.mubr.msk.f32.gmra.mxu0 %vm985_vm1, %v979_v41  ;;  %v1378_v33 = vpop.permute.xlu1 %1377 }
 0x109   : >> { %1235 = vmatprep.mubr.f32.mxu1 %v2683_v57  ;;  %1098 = vmatprep.mubr.f32.mxu0 %v2683_v57 }
 0x10c   : >> { %1598 = vmatmul.mubr.msk.f32.gmra.mxu1 %vm985_vm1, %v971_v18  ;;  %1589 = vmatmul.mubr.msk.f32.gmra.mxu0 %vm985_vm1, %v980_v13 }
 0x10d   : >> { %1241 = vmatprep.mubr.f32.mxu1 %v2683_v57  ;;  %1104 = vmatprep.mubr.f32.mxu0 %v2683_v57 }
 0x110   : >> { %1599 = vmatmul.mubr.msk.f32.gmra.mxu1 %vm985_vm1, %v972_v37  ;;  %1590 = vmatmul.mubr.msk.f32.gmra.mxu0 %vm985_vm1, %v981_v51 }
 0x111   : >> { %1247 = vmatprep.mubr.f32.mxu1 %v2683_v57  ;;  %1110 = vmatprep.mubr.f32.mxu0 %v2683_v57 }
 0x114   : >> { %1600 = vmatmul.mubr.msk.f32.gmra.mxu1 %vm985_vm1, %v973_v25  ;;  %1591 = vmatmul.mubr.msk.f32.gmra.mxu0 %vm985_vm1, %v982_v58 }
 0x115   : >> { %1253 = vmatprep.mubr.f32.mxu1 %v2683_v57  ;;  %1116 = vmatprep.mubr.f32.mxu0 %v2683_v57 }
 0x118   : >> { %1601 = vmatmul.mubr.msk.f32.gmra.mxu1 %vm985_vm1, %v974_v61  ;;  %1592 = vmatmul.mubr.msk.f32.gmra.mxu0 %vm985_vm1, %v983_v21 }
 0x119   : >> { %1259 = vmatprep.mubr.f32.mxu1 %v2683_v57  ;;  %1122 = vmatprep.mubr.f32.mxu0 %v2683_v57 }
 0x11c   : >> { %1602 = vmatmul.mubr.msk.f32.gmra.mxu1 %vm985_vm1, %v975_v27  ;;  %1593 = vmatmul.mubr.msk.f32.gmra.mxu0 %vm985_vm1, %v984_v54  ;;  %v1383_v27 = vpop.permute.xlu1 %1382 }
 0x11d   : >> { %1265 = vmatprep.mubr.f32.mxu1 %v2683_v57 }
 0x120   : >> { %1603 = vmatmul.mubr.msk.f32.gmra.mxu1 %vm985_vm1, %v976_v44 }
 0x1c0   : >> { %v1082_v60 = vpop.f32.mrf.mxu0 }
 0x1c2   : >> { %v1084_v40 = vpop.f32.mrf.mxu0 }
 0x1c4   : >> { %v1225_v22 = vpop.f32.mrf.mxu1  ;;  %v1088_v16 = vpop.f32.mrf.mxu0 }
 0x1c5   : >> { %v1226_v50 = vadd.f32 %v1225_v22, %v1082_v60 }
 0x1c6   : >> { %v1227_v11 = vpop.f32.mrf.mxu1  ;;  %v1090_v62 = vpop.f32.mrf.mxu0 }
 0x1c7   : >> { %v1228_v26 = vadd.f32 %v1227_v11, %v1084_v40  ;;  %v1320_v1 = vadd.f32 %v1283_v15, %v1226_v50  ;;  %v1318_v11 = vpop.permute.xlu0 %1317 }
 0x1c8   : >> { %v1231_v2 = vpop.f32.mrf.mxu1  ;;  %v1094_v10 = vpop.f32.mrf.mxu0 }
 0x1c9   : >> { %v1232_v32 = vadd.f32 %v1231_v2, %v1088_v16  ;;  %v1321_v31 = vadd.f32 %v1283_v15, %v1228_v26  ;;  %v1336_v53 = vmax.f32 %v1320_v1, 0.0 }
 0x1ca   : >> { %v1233_v38 = vpop.f32.mrf.mxu1  ;;  %v1096_v17 = vpop.f32.mrf.mxu0 }
 0x1cb   : >> { %v1234_v14 = vadd.f32 %v1233_v38, %v1090_v62  ;;  %v1322_v42 = vadd.f32 %v1288_v48, %v1232_v32  ;;  %v1337_v18 = vmax.f32 %v1321_v31, 0.0  ;;  %v1400_v54 = vmul.f32 %v2534_v43, %v1336_v53 }
 0x1cc   : >> { %v1237_v19 = vpop.f32.mrf.mxu1  ;;  %v1100_v24 = vpop.f32.mrf.mxu0 }
 0x1cd   : >> { %v1238_v7 = vadd.f32 %v1237_v19, %v1094_v10  ;;  %v1323_v6 = vadd.f32 %v1288_v48, %v1234_v14  ;;  %v1338_v34 = vmax.f32 %v1322_v42, 0.0  ;;  %v1401_v16 = vmul.f32 %v2534_v43, %v1337_v18 }
 0x1ce   : >> { %v1239_v59 = vpop.f32.mrf.mxu1  ;;  %v1102_v35 = vpop.f32.mrf.mxu0 }
 0x1cf   : >> { %v1240_v28 = vadd.f32 %v1239_v59, %v1096_v17  ;;  %v1324_v63 = vadd.f32 %v1293_v39, %v1238_v7  ;;  %v1339_v9 = vmax.f32 %v1323_v6, 0.0  ;;  %v1402_v13 = vmul.f32 %v1368_v30, %v1338_v34 }
 0x1d0   : >> { %v1243_v49 = vpop.f32.mrf.mxu1  ;;  %v1106_v20 = vpop.f32.mrf.mxu0 }
 0x1d1   : >> { %v1244_v5 = vadd.f32 %v1243_v49, %v1100_v24  ;;  %v1325_v8 = vadd.f32 %v1293_v39, %v1240_v28  ;;  %v1340_v57 = vmax.f32 %v1324_v63, 0.0  ;;  %v1403_v44 = vmul.f32 %v1368_v30, %v1339_v9  ;;  %v1388_v49 = vpop.permute.xlu1 %1387 }
 0x1d2   : >> { %v1245_v3 = vpop.f32.mrf.mxu1  ;;  %v1108_v0 = vpop.f32.mrf.mxu0  ;;  %v1416_v2 = vadd.f32 %v1402_v13, %v1400_v54 }
 0x1d3   : >> { %v1246_v52 = vadd.f32 %v1245_v3, %v1102_v35  ;;  %v1326_v12 = vadd.f32 %v1298_v45, %v1244_v5  ;;  %v1341_v25 = vmax.f32 %v1325_v8, 0.0  ;;  %v1404_v39 = vmul.f32 %v1373_v56, %v1340_v57  ;;  %v1393_v8 = vpop.permute.xlu0 %1392 }
 0x1d4   : >> { %v1249_v47 = vpop.f32.mrf.mxu1  ;;  %v1112_v41 = vpop.f32.mrf.mxu0  ;;  %v1429_v14 = vadd.f32 %v1403_v44, %v1401_v16 }
 0x1d5   : >> { %v1250_v23 = vadd.f32 %v1249_v47, %v1106_v20  ;;  %v1327_v36 = vadd.f32 %v1298_v45, %v1246_v52  ;;  %v1342_v58 = vmax.f32 %v1326_v12, 0.0  ;;  %v1405_v38 = vmul.f32 %v1373_v56, %v1341_v25  ;;  %v1398_v13 = vpop.permute.xlu1 %1397 }
 0x1d6   : >> { %v1251_v55 = vpop.f32.mrf.mxu1  ;;  %v1114_v21 = vpop.f32.mrf.mxu0  ;;  %v1417_v7 = vadd.f32 %v1416_v2, %v1404_v39 }
 0x1d7   : >> { %v1328_v37 = vadd.f32 %v1303_v46, %v1250_v23  ;;  %v1252_v51 = vadd.f32 %v1251_v55, %v1108_v0  ;;  %v1343_v60 = vmax.f32 %v1327_v36, 0.0  ;;  %v1406_v10 = vmul.f32 %v1378_v33, %v1342_v58 }
 0x1d8   : >> { %v1255_v61 = vpop.f32.mrf.mxu1  ;;  %v1118_v40 = vpop.f32.mrf.mxu0  ;;  %v1430_v1 = vadd.f32 %v1429_v14, %v1405_v38 }
 0x1d9   : >> { %v1329_v15 = vadd.f32 %v1303_v46, %v1252_v51  ;;  %v1256_v48 = vadd.f32 %v1255_v61, %v1112_v41  ;;  %v1344_v22 = vmax.f32 %v1328_v37, 0.0  ;;  %v1407_v59 = vmul.f32 %v1378_v33, %v1343_v60 }
 0x1da   : >> { %v1257_v45 = vpop.f32.mrf.mxu1  ;;  %v1120_v50 = vpop.f32.mrf.mxu0  ;;  %v1418_v6 = vadd.f32 %v1417_v7, %v1406_v10  ;;  %v1443_v10 = vstv %s1442_s14  ;;  %v2685_v7 = vlaneseq  ;;  %s1738_s14 = smov (%p445_p0), [#allocation4]  }
 0x1db   : >> { %v1330_v62 = vadd.f32 %v1308_v4, %v1256_v48  ;;  %v1345_v32 = vmax.f32 %v1329_v15, 0.0  ;;  %v1258_v19 = vadd.f32 %v1257_v45, %v1114_v21  ;;  %v1408_v24 = vmul.f32 %v1383_v27, %v1344_v22  ;;  %s1669_s21 = sshll.u32 (%p445_p0), %s1738_s14, 4  ;;  %s1670_s21 = int_to_ptr.vmem [resolvable:$false] %s1669_s21 }
 0x1dc   : >> { %v1261_v17 = vpop.f32.mrf.mxu1  ;;  %v1124_v28 = vpop.f32.mrf.mxu0  ;;  %v1431_v12 = vadd.f32 %v1430_v1, %v1407_v59  ;;  %v1737_v45 = vmov 1966171168   ;;  %vm1467_vm2 = vcmp.lt.s32.totalorder %v2685_v7, 256  ;;  %s1671_s18 = scalar_lea.vmem (%p445_p0), %s1670_s21, 128  ;;  %p1672_p4 = scmp.lt.s32.totalorder (%p445_p0), %s1486_s23, %s1670_s21 }
 0x1dd   : >> { %v1346_v30 = vmax.f32 %v1330_v62, 0.0  ;;  %v1262_v46 = vadd.f32 %v1261_v17, %v1118_v40  ;;  %v1331_v26 = vadd.f32 %v1308_v4, %v1258_v19  ;;  %v1409_v56 = vmul.f32 %v1383_v27, %v1345_v32  ;;  %p1673_p5 = scmp.lt.s32.totalorder (%p445_p0), %s1671_s18, %s1665_s13 }
 0x1de   : >> { %v1263_v42 = vpop.f32.mrf.mxu1  ;;  %v1126_v3 = vpop.f32.mrf.mxu0  ;;  %v1419_v33 = vadd.f32 %v1418_v6, %v1408_v24  ;;  %v1450_v40 = vunpack.c.l.s4 %v1737_v45 }
 0x1df   : >> { %v1332_v35 = vadd.f32 %v1313_v29, %v1262_v46  ;;  %v1264_v43 = vadd.f32 %v1263_v42, %v1120_v50  ;;  %v1347_v63 = vmax.f32 %v1331_v26, 0.0  ;;  %v1410_v20 = vmul.f32 %v1388_v49, %v1346_v30  ;;  %v2684_v50 = vld [vmem:[#allocation7_spill] sm:$0xff]  ;;  %p1674_p7 = por (%p445_p0), %p1673_p5, %p1672_p4 }
 0x1e0   : >> { %v1267_v5 = vpop.f32.mrf.mxu1  ;;  %v1432_v57 = vadd.f32 %v1431_v12, %v1409_v56  ;;  %v1451_v38 = vunpack.c.0.s8 %v1450_v40 }
 0x1e1   : >> { %v1348_v31 = vmax.f32 %v1332_v35, 0.0  ;;  %v1333_v34 = vadd.f32 %v1313_v29, %v1264_v43  ;;  %v1268_v52 = vadd.f32 %v1267_v5, %v1124_v28  ;;  %v1411_v47 = vmul.f32 %v1388_v49, %v1347_v63  ;;  %p1675_p9 = pnand (%p445_p0), %p1674_p7, %p1668_p3 }
 0x1e2   : >> { %v1269_v4 = vpop.f32.mrf.mxu1  ;;  %v1420_v36 = vadd.f32 %v1419_v33, %v1410_v20  ;;  %v1454_v14 = vsub.s32 %v1451_v38, %v2684_v50 }
 0x1e3   : >> { %v1412_v0 = vmul.f32 %v1393_v8, %v1348_v31  ;;  %v1349_v53 = vmax.f32 %v1333_v34, 0.0  ;;  %v1334_v9 = vadd.f32 %v1318_v11, %v1268_v52  ;;  %v1270_v23 = vadd.f32 %v1269_v4, %v1126_v3 }
 0x1e4   : >> { %v1433_v37 = vadd.f32 %v1432_v57, %v1411_v47 }
 0x1e5   : >> { %v1413_v55 = vmul.f32 %v1393_v8, %v1349_v53  ;;  %v1350_v41 = vmax.f32 %v1334_v9, 0.0  ;;  %v1335_v18 = vadd.f32 %v1318_v11, %v1270_v23  ;;  %v1421_v51 = vadd.f32 %v1420_v36, %v1412_v0 }
 0x1e7   : >> { %v1414_v25 = vmul.f32 %v1398_v13, %v1350_v41  ;;  %v1351_v29 = vmax.f32 %v1335_v18, 0.0  ;;  %v1434_v58 = vadd.f32 %v1433_v37, %v1413_v55 }
 0x1e9   : >> { %v1422_v61 = vadd.f32 %v1421_v51, %v1414_v25  ;;  %v1415_v21 = vmul.f32 %v1398_v13, %v1351_v29 }
 0x1eb   : >> { %v1423_v27 = vrot.slane %v1422_v61, 4  ;;  %v1435_v54 = vadd.f32 %v1434_v58, %v1415_v21 }
 0x1ed   : >> { %v1424_v44 = vadd.f32 %v1423_v27, %v1422_v61  ;;  %v1436_v15 = vrot.slane %v1435_v54, 4 }
 0x1ef   : >> { %v1425_v48 = vrot.slane %v1424_v44, 2  ;;  %v1437_v39 = vadd.f32 %v1436_v15, %v1435_v54 }
 0x1f1   : >> { %v1426_v60 = vadd.f32 %v1425_v48, %v1424_v44  ;;  %v1438_v22 = vrot.slane %v1437_v39, 2 }
 0x1f3   : >> { %v1427_v11 = vrot.slane %v1426_v60, 1  ;;  %v1439_v16 = vadd.f32 %v1438_v22, %v1437_v39 }
 0x1f5   : >> { %v1428_v2 = vadd.f32 %v1427_v11, %v1426_v60  ;;  %v1440_v62 = vrot.slane %v1439_v16, 1 }
 0x1f7   : >> { %v1441_v32 = vadd.f32 %v1440_v62, %v1439_v16  ;;  %v1444_v19 = vadd.f32 %v1443_v10, %v1428_v2 }
 0x1f9   : >> { %v1445_v17 = vadd.f32 %v1443_v10, %v1441_v32 }
 0x1fb   : >> { %v1448_v30 = vcombine.low %v1444_v19, %v1445_v17 }
 0x1fd   : >> { %v1455_v46 = vrot.slane %v1448_v30, %v1454_v14  ;;  %447 = sbr.rel (!%p445_p0) target bundleno = 59 (0x3b), region = 128 }
 0x1ff   : >> { %v1462_v59 = vrot.slane %v1455_v46, %v1454_v14 }
 0x201   : >> { %1469 = vst.msk [vmem:[%s1464_s22] sm:$0x3] %vm1467_vm2, %v1462_v59 }
 0x202   : > { %1678 = shalt.err (!%p1675_p9)
}
 0x203   : > { %s1679_s7 = scalar_lea.hbm %s1483_s11, 64  ;;  %s1683_s20 = scalar_lea.hbm %s2588_s8, 256 }
 0x204   : > { %p1680_p10 = scmp.ne.s32.totalorder %s1483_s11, %s1679_s7  ;;  %p1684_p13 = scmp.lt.s32.totalorder %s1483_s11, %s2588_s8 }
 0x205   : > { %p1685_p0 = scmp.lt.s32.totalorder %s1683_s20, %s1679_s7 }
 0x206   : > { %p1681_p11 = pnand %p1680_p10, %p1826_p6 }
 0x207   : > { %p1686_p1 = por %p1685_p0, %p1684_p13 }
 0x208   : > { %p1682_p12 = pneg %p1681_p11 }
 0x20a   : > { %p1687_p2 = pnand %p1686_p1, %p1682_p12 }
 0x20c   : > { %1690 = shalt.err (!%p1687_p2)
}
 0x20d   : > { %1613 = dma.vmem_to_hbm [thread:$0]  (%p1826_p6), %s1486_s23, 64, %s1483_s11, %s1471_s27  }
 0x20e PF: > { %p1619_p3 = scmp.ge.s32.totalorder %s1729_s10, 2  ;;  %s1497_s26 = sand.u32 1, %s1717_s29  }
 0x20f   : > { %s1498_s28 = scalar_lea.sflag [#allocation5], %s1497_s26 }
 0x210   : > { %p1616_p4 = pnand %p1619_p3, %p1830_p8 }
 0x212   : > { %p1617_p5 = pneg %p1616_p4 }
 0x214   : > { %1712 = dma.done.wait (%p1617_p5), %s1498_s28, 64  }
 0x215   : > { %1714 = vsyncadd (%p1617_p5), %s1498_s28, 4294967232  ;;  %p19_p7 = scmp.ge.s32.totalorder %s1812_s12, 6   ;;  %s2686_s29 = smov %s1721_s30 }
 0x216   : > { %s2687_s30 = smov %s1725_s9  ;;  %s2688_s9 = smov %s1824_s15 }
 0x217   : > { %s2689_s10 = smov %s1812_s12  ;;  %21 = sbr.rel (!%p19_p7) target bundleno = 5 (0x5), region = 139 }
 0x21c   :  { %1503 = vsyncpa [#allocation5], 1 }
 0x21d   :  { %1505 = vsyncpa [#allocation5 + $0x1], 1 }

</bundles_post_ra>
